<compile_context>
chip_gen: v7x
topology: tpu7x:2x2x1
jax: 0.10.0
libtpu: 0.0.40
codegen_flags: <defaults>
</compile_context>

<pallas_src>
import functools

import jax
import jax.numpy as jnp
from jax.experimental import pallas as pl
from jax.experimental.pallas import tpu as pltpu


# ----------------------------- helpers -----------------------------

def _round_up(x, m):
    return (x + m - 1) // m * m


def _default_vmem_limit():
    # ~100 MiB on v5e/v6e (128 MiB physical), ~48 MiB on v7x (64 MiB physical).
    try:
        cap = int(pltpu.get_tpu_info().vmem_capacity_bytes)
    except Exception:
        cap = 64 * 1024 * 1024
    return int(min(100 * 1024 * 1024, cap * 3 // 4))


_VMEM_LIMIT = _default_vmem_limit()


def _conv_tiles(K, cout):
    """Padded GEMM dims + tile sizes (lane-dense: multiples of 128)."""
    K_pad = _round_up(max(K, 1), 128)
    TK = K_pad if K_pad <= 2048 else 512
    K_pad = _round_up(K_pad, TK)
    TN = min(256, _round_up(cout, 128))
    Cout_pad = _round_up(cout, TN)
    return K_pad, TK, Cout_pad, TN


# ----------------------------- Pallas kernels -----------------------------

def _conv_matmul_kernel(p_ref, w_ref, b_ref, o_ref, acc_ref):
    # Tiled matmul: bf16 operands, f32 accumulator, bias fused into epilogue.
    @pl.when(pl.program_id(2) == 0)
    def _():
        acc_ref[...] = jnp.zeros_like(acc_ref)

    acc_ref[...] += jnp.dot(p_ref[...], w_ref[...],
                            preferred_element_type=jnp.float32)

    @pl.when(pl.program_id(2) == pl.num_programs(2) - 1)
    def _():
        o_ref[...] = acc_ref[...] + b_ref[...]


def _instance_norm_kernel(*refs, act, has_res, has_noise, eps=1e-5):
    # Block: [1, H*W, C_tile]; per-(n, c) biased mean/var over the H*W axis.
    idx = 0
    x_ref = refs[idx]; idx += 1
    r_ref = refs[idx] if has_res else None
    idx += int(has_res)
    n_ref = refs[idx] if has_noise else None
    idx += int(has_noise)
    o_ref = refs[idx]; idx += 1
    z_ref = refs[idx] if has_noise else None

    x = x_ref[...]
    mean = jnp.mean(x, axis=1, keepdims=True)
    xc = x - mean
    var = jnp.mean(xc * xc, axis=1, keepdims=True)
    y = xc * jax.lax.rsqrt(var + eps)
    if act == "relu":
        y = jnp.maximum(y, 0.0)
    elif act == "lrelu":
        y = jnp.where(y > 0.0, y, 0.2 * y)   # LeakyReLU(0.2), per module spec
    if has_res:
        y = r_ref[...] + y                   # x + IN(conv(...))
    o_ref[...] = y
    if has_noise:
        z_ref[...] = y + n_ref[...]          # fused reparameterization


# ----------------------------- Pallas wrappers -----------------------------

def conv2d(x_nhwc, p, kh, kw, stride, cout):
    """Conv via im2col + tiled Pallas matmul(+bias).  p["w"] is the padded
    bf16 weight [K_pad, Cout_pad] flattened in (i, j, cin) order (to load a
    torch OIHW checkpoint, permute to (kh, kw, Cin, Cout) first)."""
    N, H, W, C = x_nhwc.shape
    Ho = (H - kh) // stride + 1
    Wo = (W - kw) // stride + 1
    K = kh * kw * C
    K_pad, TK, Cout_pad, TN = _conv_tiles(K, cout)
    w, b = p["w"], p["b"]
    assert w.shape == (K_pad, Cout_pad) and b.shape == (1, Cout_pad)

    # bf16 activations: halves HBM traffic of the patch matrix + feeds the MXU
    # at its bf16 rate; accumulation stays f32.
    xb = x_nhwc.astype(jnp.bfloat16)
    cols = []
    for i in range(kh):
        for j in range(kw):
            cols.append(
                xb[:, i:i + stride * (Ho - 1) + 1:stride,
                   j:j + stride * (Wo - 1) + 1:stride, :])
    patches = jnp.stack(cols, axis=3).reshape(N * Ho * Wo, K)

    M = N * Ho * Wo
    M_pad = _round_up(M, 8)
    TM = min(256, M_pad)
    M_pad = _round_up(M_pad, TM)
    patches = jnp.pad(patches, ((0, M_pad - M), (0, K_pad - K)))

    grid = (M_pad // TM, Cout_pad // TN, K_pad // TK)
    out = pl.pallas_call(
        _conv_matmul_kernel,
        out_shape=jax.ShapeDtypeStruct((M_pad, Cout_pad), jnp.float32),
        grid=grid,
        in_specs=[
            pl.BlockSpec((TM, TK), lambda m, n, k: (m, k)),
            # weight / bias index maps do not depend on the M axis -> resident
            pl.BlockSpec((TK, TN), lambda m, n, k: (k, n)),
            pl.BlockSpec((1, TN), lambda m, n, k: (0, n)),
        ],
        out_specs=pl.BlockSpec((TM, TN), lambda m, n, k: (m, n)),
        scratch_shapes=[pltpu.VMEM((TM, TN), jnp.float32)],
        compiler_params=pltpu.CompilerParams(
            dimension_semantics=("parallel", "parallel", "arbitrary"),
            vmem_limit_bytes=_VMEM_LIMIT),
    )(patches, w, b)
    return out[:M, :cout].reshape(N, Ho, Wo, cout)


def instance_norm(x_nhwc, act="none", residual=None, noise=None):
    """InstanceNorm2d (affine=False, eps=1e-5) + activation
    (+ fused residual add) (+ fused z = out + noise second output)."""
    N, H, W, C = x_nhwc.shape
    HW = H * W
    TC = C if C <= 128 else 128
    assert C % TC == 0
    spec = pl.BlockSpec((1, HW, TC), lambda n, c: (n, 0, c))

    args = [x_nhwc.reshape(N, HW, C)]
    in_specs = [spec]
    if residual is not None:
        args.append(residual.reshape(N, HW, C))
        in_specs.append(spec)
    if noise is not None:
        args.append(noise.reshape(N, HW, C))
        in_specs.append(spec)

    out_shape = jax.ShapeDtypeStruct((N, HW, C), jnp.float32)
    out_specs = spec
    if noise is not None:
        out_shape = (out_shape, jax.ShapeDtypeStruct((N, HW, C), jnp.float32))
        out_specs = (spec, spec)

    kernel = functools.partial(_instance_norm_kernel, act=act,
                               has_res=residual is not None,
                               has_noise=noise is not None)
    out = pl.pallas_call(
        kernel,
        out_shape=out_shape,
        grid=(N, C // TC),
        in_specs=in_specs,
        out_specs=out_specs,
        compiler_params=pltpu.CompilerParams(
            dimension_semantics=("parallel", "parallel"),
            vmem_limit_bytes=_VMEM_LIMIT),
    )(*args)

    if noise is not None:
        o, z = out
        return o.reshape(N, H, W, C), z.reshape(N, H, W, C)
    return out.reshape(N, H, W, C)


# ----------------------------- model glue -----------------------------

def reflect_pad(x, p):
    return jnp.pad(x, ((0, 0), (p, p), (p, p), (0, 0)), mode="reflect")


def _init_conv(key, kh, kw, cin, cout):
    K = kh * kw * cin
    K_pad, _, Cout_pad, _ = _conv_tiles(K, cout)
    kw_, kb_ = jax.random.split(key)
    w = jax.random.normal(kw_, (K, cout), jnp.float32) * 0.05
    b = jax.random.normal(kb_, (cout,), jnp.float32) * 0.05
    w_pad = (jnp.zeros((K_pad, Cout_pad), jnp.bfloat16)
             .at[:K, :cout].set(w.astype(jnp.bfloat16)))
    b_pad = jnp.zeros((1, Cout_pad), jnp.float32).at[0, :cout].set(b)
    return {"w": w_pad, "b": b_pad}


def init_params(key, in_channels, dim, n_downsample):
    keys = iter(jax.random.split(key, 16))
    params = {"stem": _init_conv(next(keys), 7, 7, in_channels, dim)}
    d = dim
    params["down"] = []
    for _ in range(n_downsample):
        params["down"].append(_init_conv(next(keys), 4, 4, d, 2 * d))
        d *= 2

    def res_pair(k):
        k1, k2 = jax.random.split(k)
        return (_init_conv(k1, 3, 3, d, d), _init_conv(k2, 3, 3, d, d))

    params["res"] = [res_pair(next(keys)) for _ in range(3)]
    params["shared"] = res_pair(next(keys))   # shared_block = ResidualBlock(d)
    return params


def residual_block(x, p1, p2, c, noise=None):
    y = reflect_pad(x, 1)
    y = conv2d(y, p1, 3, 3, 1, c)
    y = instance_norm(y, act="relu")
    y = reflect_pad(y, 1)
    y = conv2d(y, p2, 3, 3, 1, c)
    # residual add (and, for the shared block, z = mu + noise) fused into IN
    return instance_norm(y, act="none", residual=x, noise=noise)


def encoder_forward(x_nchw, params, noise_nchw, *, dim, n_downsample):
    x = jnp.transpose(x_nchw, (0, 2, 3, 1)).astype(jnp.float32)  # NCHW -> NHWC
    d = dim

    # [ReflectionPad2d(3), Conv2d(cin, dim, 7), InstanceNorm, LeakyReLU(0.2)]
    x = reflect_pad(x, 3)
    x = conv2d(x, params["stem"], 7, 7, 1, d)
    x = instance_norm(x, act="lrelu")

    # downsampling: [Conv2d(d, 2d, 4, s=2, p=1), InstanceNorm, ReLU]
    for p in params["down"]:
        x = jnp.pad(x, ((0, 0), (1, 1), (1, 1), (0, 0)))  # zero pad 1
        x = conv2d(x, p, 4, 4, 2, 2 * d)
        x = instance_norm(x, act="relu")
        d *= 2

    # 3 residual blocks
    for p1, p2 in params["res"]:
        x = residual_block(x, p1, p2, d)

    # shared block -> mu; z = mu + N(0, 1) fused into the last IN kernel
    noise = jnp.transpose(noise_nchw, (0, 2, 3, 1)).astype(jnp.float32)
    p1, p2 = params["shared"]
    mu, z = residual_block(x, p1, p2, d, noise=noise)

    return jnp.transpose(mu, (0, 3, 1, 2)), jnp.transpose(z, (0, 3, 1, 2))


if __name__ == "__main__":
    key = jax.random.PRNGKey(0)
    k_x, k_p, k_n = jax.random.split(key, 3)

    in_channels, dim, n_down = 3, 8, 2        # small config (torch default dim=64)
    N, H, W = 2, 16, 16
    out_dim = dim * (2 ** n_down)             # 32
    out_h, out_w = H // (2 ** n_down), W // (2 ** n_down)  # 4, 4

    x = jax.random.normal(k_x, (N, in_channels, H, W), jnp.float32)
    params = init_params(k_p, in_channels, dim, n_down)
    noise = jax.random.normal(k_n, (N, out_dim, out_h, out_w), jnp.float32)

    fwd = jax.jit(functools.partial(encoder_forward, dim=dim,
                                    n_downsample=n_down))
    mu, z = fwd(x, params, noise)
    jax.block_until_ready((mu, z))

    assert mu.shape == (N, out_dim, out_h, out_w), mu.shape
    assert z.shape == (N, out_dim, out_h, out_w), z.shape
    assert mu.dtype == jnp.float32 and z.dtype == jnp.float32
    assert bool(jnp.all(jnp.isfinite(mu))) and bool(jnp.all(jnp.isfinite(z)))
    print("KERNEL_OK")
</pallas_src>

<mosaic_0001>
module attributes {stable_mosaic.version = 11 : i64} {
  func.func @_conv_matmul_kernel(%arg0: i32, %arg1: i32, %arg2: i32, %arg3: memref<256x256xbf16, #tpu.memory_space<vmem>>, %arg4: memref<256x128xbf16, #tpu.memory_space<vmem>>, %arg5: memref<1x128xf32, #tpu.memory_space<vmem>>, %arg6: memref<256x128xf32, #tpu.memory_space<vmem>>, %arg7: memref<256x128xf32, #tpu.memory_space<vmem>>) attributes {dimension_semantics = [#tpu.dimension_semantics<parallel>, #tpu.dimension_semantics<parallel>, #tpu.dimension_semantics<arbitrary>], iteration_bounds = array<i64: 2, 1, 1>, scalar_prefetch = 0 : i64, scratch_operands = 1 : i64, tpu.core_type = #tpu.core_type<tc>, window_params = [{transform_indices = @transform_0, window_bounds = array<i64: 256, 256>}, {transform_indices = @transform_1, window_bounds = array<i64: 256, 128>}, {transform_indices = @transform_2, window_bounds = array<i64: 1, 128>}, {transform_indices = @transform_3, window_bounds = array<i64: 256, 128>}]} {
    %c0_i32 = arith.constant 0 : i32
    %0 = arith.cmpi eq, %arg2, %c0_i32 : i32
    %1 = arith.extui %0 : i1 to i32
    %c0_i32_0 = arith.constant 0 : i32
    %2 = arith.cmpi ne, %1, %c0_i32_0 : i32
    scf.if %2 {
      %cst_10 = arith.constant 0.000000e+00 : f32
      %12 = vector.broadcast %cst_10 : f32 to vector<256x128xf32>
      %c0_11 = arith.constant 0 : index
      %c0_12 = arith.constant 0 : index
      %13 = vector.load %arg7[%c0_11, %c0_12] : memref<256x128xf32, #tpu.memory_space<vmem>>, vector<256x128xf32>
      tpu.vector_store %arg7[%c0_11, %c0_12], %12 {strides = array<i32>} : memref<256x128xf32, #tpu.memory_space<vmem>>, vector<256x128xf32>,
    } else {
    }
    %c0 = arith.constant 0 : index
    %c0_1 = arith.constant 0 : index
    %3 = vector.load %arg7[%c0, %c0_1] : memref<256x128xf32, #tpu.memory_space<vmem>>, vector<256x128xf32>
    %c0_2 = arith.constant 0 : index
    %c0_3 = arith.constant 0 : index
    %4 = vector.load %arg3[%c0_2, %c0_3] : memref<256x256xbf16, #tpu.memory_space<vmem>>, vector<256x256xbf16>
    %c0_4 = arith.constant 0 : index
    %c0_5 = arith.constant 0 : index
    %5 = vector.load %arg4[%c0_4, %c0_5] : memref<256x128xbf16, #tpu.memory_space<vmem>>, vector<256x128xbf16>
    %cst = arith.constant dense<0.000000e+00> : vector<256x128xf32>
    %6 = tpu.matmul %4, %5, %cst {dimension_numbers = #tpu.dot_dimension_numbers<[1], [0], [0], [1], [0, 0, 1, 1], [], []>} : vector<256x256xbf16>, vector<256x128xbf16>, vector<256x128xf32> -> vector<256x128xf32>
    %7 = arith.addf %3, %6 : vector<256x128xf32>
    %c0_6 = arith.constant 0 : index
    %c0_7 = arith.constant 0 : index
    %8 = vector.load %arg7[%c0_6, %c0_7] : memref<256x128xf32, #tpu.memory_space<vmem>>, vector<256x128xf32>
    tpu.vector_store %arg7[%c0_6, %c0_7], %7 {strides = array<i32>} : memref<256x128xf32, #tpu.memory_space<vmem>>, vector<256x128xf32>,
    %c0_i32_8 = arith.constant 0 : i32
    %9 = arith.cmpi eq, %arg2, %c0_i32_8 : i32
    %10 = arith.extui %9 : i1 to i32
    %c0_i32_9 = arith.constant 0 : i32
    %11 = arith.cmpi ne, %10, %c0_i32_9 : i32
    scf.if %11 {
      %c0_10 = arith.constant 0 : index
      %c0_11 = arith.constant 0 : index
      %12 = vector.load %arg7[%c0_10, %c0_11] : memref<256x128xf32, #tpu.memory_space<vmem>>, vector<256x128xf32>
      %c0_12 = arith.constant 0 : index
      %c0_13 = arith.constant 0 : index
      %13 = vector.load %arg5[%c0_12, %c0_13] : memref<1x128xf32, #tpu.memory_space<vmem>>, vector<1x128xf32>
      %14 = vector.broadcast %13 : vector<1x128xf32> to vector<256x128xf32>
      %15 = arith.addf %12, %14 : vector<256x128xf32>
      %c0_14 = arith.constant 0 : index
      %c0_15 = arith.constant 0 : index
      %16 = vector.load %arg6[%c0_14, %c0_15] : memref<256x128xf32, #tpu.memory_space<vmem>>, vector<256x128xf32>
      tpu.vector_store %arg6[%c0_14, %c0_15], %15 {strides = array<i32>} : memref<256x128xf32, #tpu.memory_space<vmem>>, vector<256x128xf32>,
    } else {
    }
    return
  }
  func.func @transform_0(%arg0: i32, %arg1: i32, %arg2: i32) -> (i32, i32) {
    %c0_i32 = arith.constant 0 : i32
    return %arg0, %arg2 : i32, i32
  }
  func.func @transform_1(%arg0: i32, %arg1: i32, %arg2: i32) -> (i32, i32) {
    %c0_i32 = arith.constant 0 : i32
    return %arg2, %arg1 : i32, i32
  }
  func.func @transform_2(%arg0: i32, %arg1: i32, %arg2: i32) -> (i32, i32) {
    %c0_i32 = arith.constant 0 : i32
    %c0_i32_0 = arith.constant 0 : i32
    return %c0_i32, %arg1 : i32, i32
  }
  func.func @transform_3(%arg0: i32, %arg1: i32, %arg2: i32) -> (i32, i32) {
    %c0_i32 = arith.constant 0 : i32
    return %arg0, %arg1 : i32, i32
  }
}

module attributes {stable_mosaic.version = 11 : i64} {
  func.func @_instance_norm_kernel(%arg0: i32, %arg1: i32, %arg2: memref<1x256x8xf32, #tpu.memory_space<vmem>>, %arg3: memref<1x256x8xf32, #tpu.memory_space<vmem>>) attributes {dimension_semantics = [#tpu.dimension_semantics<parallel>, #tpu.dimension_semantics<parallel>], iteration_bounds = array<i64: 2, 1>, scalar_prefetch = 0 : i64, scratch_operands = 0 : i64, tpu.core_type = #tpu.core_type<tc>, window_params = [{transform_indices = @transform_0, window_bounds = array<i64: 1, 256, 8>}, {transform_indices = @transform_1, window_bounds = array<i64: 1, 256, 8>}]} {
    %c0 = arith.constant 0 : index
    %c0_0 = arith.constant 0 : index
    %c0_1 = arith.constant 0 : index
    %0 = vector.load %arg2[%c0, %c0_0, %c0_1] : memref<1x256x8xf32, #tpu.memory_space<vmem>>, vector<1x256x8xf32>
    %cst = arith.constant dense<0.000000e+00> : vector<1x8xf32>
    %1 = vector.multi_reduction <add>, %0, %cst [1] : vector<1x256x8xf32> to vector<1x8xf32>
    %2 = vector.shape_cast %1 : vector<1x8xf32> to vector<1x1x8xf32>
    %cst_2 = arith.constant 2.560000e+02 : f32
    %3 = vector.broadcast %cst_2 : f32 to vector<1x1x8xf32>
    %4 = arith.divf %2, %3 : vector<1x1x8xf32>
    %5 = vector.broadcast %4 : vector<1x1x8xf32> to vector<1x256x8xf32>
    %6 = arith.subf %0, %5 : vector<1x256x8xf32>
    %7 = arith.mulf %6, %6 : vector<1x256x8xf32>
    %cst_3 = arith.constant dense<0.000000e+00> : vector<1x8xf32>
    %8 = vector.multi_reduction <add>, %7, %cst_3 [1] : vector<1x256x8xf32> to vector<1x8xf32>
    %9 = vector.shape_cast %8 : vector<1x8xf32> to vector<1x1x8xf32>
    %cst_4 = arith.constant 2.560000e+02 : f32
    %10 = vector.broadcast %cst_4 : f32 to vector<1x1x8xf32>
    %11 = arith.divf %9, %10 : vector<1x1x8xf32>
    %cst_5 = arith.constant 9.99999974E-6 : f32
    %12 = vector.broadcast %cst_5 : f32 to vector<1x1x8xf32>
    %13 = arith.addf %11, %12 : vector<1x1x8xf32>
    %14 = math.rsqrt %13 : vector<1x1x8xf32>
    %15 = vector.broadcast %14 : vector<1x1x8xf32> to vector<1x256x8xf32>
    %16 = arith.mulf %6, %15 : vector<1x256x8xf32>
    %cst_6 = arith.constant 0.000000e+00 : f32
    %17 = vector.broadcast %cst_6 : f32 to vector<1x256x8xf32>
    %18 = arith.cmpf ogt, %16, %17 : vector<1x256x8xf32>
    %cst_7 = arith.constant 2.000000e-01 : f32
    %19 = vector.broadcast %cst_7 : f32 to vector<1x256x8xf32>
    %20 = arith.mulf %19, %16 : vector<1x256x8xf32>
    %21 = arith.select %18, %16, %20 : vector<1x256x8xi1>, vector<1x256x8xf32>
    %c0_8 = arith.constant 0 : index
    %c0_9 = arith.constant 0 : index
    %c0_10 = arith.constant 0 : index
    %22 = vector.load %arg3[%c0_8, %c0_9, %c0_10] : memref<1x256x8xf32, #tpu.memory_space<vmem>>, vector<1x256x8xf32>
    tpu.vector_store %arg3[%c0_8, %c0_9, %c0_10], %21 {strides = array<i32>} : memref<1x256x8xf32, #tpu.memory_space<vmem>>, vector<1x256x8xf32>,
    return
  }
  func.func @transform_0(%arg0: i32, %arg1: i32) -> (i32, i32, i32) {
    %c0_i32 = arith.constant 0 : i32
    %c0_i32_0 = arith.constant 0 : i32
    return %arg0, %c0_i32, %arg1 : i32, i32, i32
  }
  func.func @transform_1(%arg0: i32, %arg1: i32) -> (i32, i32, i32) {
    %c0_i32 = arith.constant 0 : i32
    %c0_i32_0 = arith.constant 0 : i32
    return %arg0, %c0_i32, %arg1 : i32, i32, i32
  }
}

module attributes {stable_mosaic.version = 11 : i64} {
  func.func @_conv_matmul_kernel(%arg0: i32, %arg1: i32, %arg2: i32, %arg3: memref<128x128xbf16, #tpu.memory_space<vmem>>, %arg4: memref<128x128xbf16, #tpu.memory_space<vmem>>, %arg5: memref<1x128xf32, #tpu.memory_space<vmem>>, %arg6: memref<128x128xf32, #tpu.memory_space<vmem>>, %arg7: memref<128x128xf32, #tpu.memory_space<vmem>>) attributes {dimension_semantics = [#tpu.dimension_semantics<parallel>, #tpu.dimension_semantics<parallel>, #tpu.dimension_semantics<arbitrary>], iteration_bounds = array<i64: 1, 1, 1>, scalar_prefetch = 0 : i64, scratch_operands = 1 : i64, tpu.core_type = #tpu.core_type<tc>, window_params = [{transform_indices = @transform_0, window_bounds = array<i64: 128, 128>}, {transform_indices = @transform_1, window_bounds = array<i64: 128, 128>}, {transform_indices = @transform_2, window_bounds = array<i64: 1, 128>}, {transform_indices = @transform_3, window_bounds = array<i64: 128, 128>}]} {
    %c0_i32 = arith.constant 0 : i32
    %0 = arith.cmpi eq, %arg2, %c0_i32 : i32
    %1 = arith.extui %0 : i1 to i32
    %c0_i32_0 = arith.constant 0 : i32
    %2 = arith.cmpi ne, %1, %c0_i32_0 : i32
    scf.if %2 {
      %cst_10 = arith.constant 0.000000e+00 : f32
      %12 = vector.broadcast %cst_10 : f32 to vector<128x128xf32>
      %c0_11 = arith.constant 0 : index
      %c0_12 = arith.constant 0 : index
      %13 = vector.load %arg7[%c0_11, %c0_12] : memref<128x128xf32, #tpu.memory_space<vmem>>, vector<128x128xf32>
      tpu.vector_store %arg7[%c0_11, %c0_12], %12 {strides = array<i32>} : memref<128x128xf32, #tpu.memory_space<vmem>>, vector<128x128xf32>,
    } else {
    }
    %c0 = arith.constant 0 : index
    %c0_1 = arith.constant 0 : index
    %3 = vector.load %arg7[%c0, %c0_1] : memref<128x128xf32, #tpu.memory_space<vmem>>, vector<128x128xf32>
    %c0_2 = arith.constant 0 : index
    %c0_3 = arith.constant 0 : index
    %4 = vector.load %arg3[%c0_2, %c0_3] : memref<128x128xbf16, #tpu.memory_space<vmem>>, vector<128x128xbf16>
    %c0_4 = arith.constant 0 : index
    %c0_5 = arith.constant 0 : index
    %5 = vector.load %arg4[%c0_4, %c0_5] : memref<128x128xbf16, #tpu.memory_space<vmem>>, vector<128x128xbf16>
    %cst = arith.constant dense<0.000000e+00> : vector<128x128xf32>
    %6 = tpu.matmul %4, %5, %cst {dimension_numbers = #tpu.dot_dimension_numbers<[1], [0], [0], [1], [0, 0, 1, 1], [], []>} : vector<128x128xbf16>, vector<128x128xbf16>, vector<128x128xf32> -> vector<128x128xf32>
    %7 = arith.addf %3, %6 : vector<128x128xf32>
    %c0_6 = arith.constant 0 : index
    %c0_7 = arith.constant 0 : index
    %8 = vector.load %arg7[%c0_6, %c0_7] : memref<128x128xf32, #tpu.memory_space<vmem>>, vector<128x128xf32>
    tpu.vector_store %arg7[%c0_6, %c0_7], %7 {strides = array<i32>} : memref<128x128xf32, #tpu.memory_space<vmem>>, vector<128x128xf32>,
    %c0_i32_8 = arith.constant 0 : i32
    %9 = arith.cmpi eq, %arg2, %c0_i32_8 : i32
    %10 = arith.extui %9 : i1 to i32
    %c0_i32_9 = arith.constant 0 : i32
    %11 = arith.cmpi ne, %10, %c0_i32_9 : i32
    scf.if %11 {
      %c0_10 = arith.constant 0 : index
      %c0_11 = arith.constant 0 : index
      %12 = vector.load %arg7[%c0_10, %c0_11] : memref<128x128xf32, #tpu.memory_space<vmem>>, vector<128x128xf32>
      %c0_12 = arith.constant 0 : index
      %c0_13 = arith.constant 0 : index
      %13 = vector.load %arg5[%c0_12, %c0_13] : memref<1x128xf32, #tpu.memory_space<vmem>>, vector<1x128xf32>
      %14 = vector.broadcast %13 : vector<1x128xf32> to vector<128x128xf32>
      %15 = arith.addf %12, %14 : vector<128x128xf32>
      %c0_14 = arith.constant 0 : index
      %c0_15 = arith.constant 0 : index
      %16 = vector.load %arg6[%c0_14, %c0_15] : memref<128x128xf32, #tpu.memory_space<vmem>>, vector<128x128xf32>
      tpu.vector_store %arg6[%c0_14, %c0_15], %15 {strides = array<i32>} : memref<128x128xf32, #tpu.memory_space<vmem>>, vector<128x128xf32>,
    } else {
    }
    return
  }
  func.func @transform_0(%arg0: i32, %arg1: i32, %arg2: i32) -> (i32, i32) {
    %c0_i32 = arith.constant 0 : i32
    return %arg0, %arg2 : i32, i32
  }
  func.func @transform_1(%arg0: i32, %arg1: i32, %arg2: i32) -> (i32, i32) {
    %c0_i32 = arith.constant 0 : i32
    return %arg2, %arg1 : i32, i32
  }
  func.func @transform_2(%arg0: i32, %arg1: i32, %arg2: i32) -> (i32, i32) {
    %c0_i32 = arith.constant 0 : i32
    %c0_i32_0 = arith.constant 0 : i32
    return %c0_i32, %arg1 : i32, i32
  }
  func.func @transform_3(%arg0: i32, %arg1: i32, %arg2: i32) -> (i32, i32) {
    %c0_i32 = arith.constant 0 : i32
    return %arg0, %arg1 : i32, i32
  }
}

module attributes {stable_mosaic.version = 11 : i64} {
  func.func @_instance_norm_kernel(%arg0: i32, %arg1: i32, %arg2: memref<1x64x16xf32, #tpu.memory_space<vmem>>, %arg3: memref<1x64x16xf32, #tpu.memory_space<vmem>>) attributes {dimension_semantics = [#tpu.dimension_semantics<parallel>, #tpu.dimension_semantics<parallel>], iteration_bounds = array<i64: 2, 1>, scalar_prefetch = 0 : i64, scratch_operands = 0 : i64, tpu.core_type = #tpu.core_type<tc>, window_params = [{transform_indices = @transform_0, window_bounds = array<i64: 1, 64, 16>}, {transform_indices = @transform_1, window_bounds = array<i64: 1, 64, 16>}]} {
    %c0 = arith.constant 0 : index
    %c0_0 = arith.constant 0 : index
    %c0_1 = arith.constant 0 : index
    %0 = vector.load %arg2[%c0, %c0_0, %c0_1] : memref<1x64x16xf32, #tpu.memory_space<vmem>>, vector<1x64x16xf32>
    %cst = arith.constant dense<0.000000e+00> : vector<1x16xf32>
    %1 = vector.multi_reduction <add>, %0, %cst [1] : vector<1x64x16xf32> to vector<1x16xf32>
    %2 = vector.shape_cast %1 : vector<1x16xf32> to vector<1x1x16xf32>
    %cst_2 = arith.constant 6.400000e+01 : f32
    %3 = vector.broadcast %cst_2 : f32 to vector<1x1x16xf32>
    %4 = arith.divf %2, %3 : vector<1x1x16xf32>
    %5 = vector.broadcast %4 : vector<1x1x16xf32> to vector<1x64x16xf32>
    %6 = arith.subf %0, %5 : vector<1x64x16xf32>
    %7 = arith.mulf %6, %6 : vector<1x64x16xf32>
    %cst_3 = arith.constant dense<0.000000e+00> : vector<1x16xf32>
    %8 = vector.multi_reduction <add>, %7, %cst_3 [1] : vector<1x64x16xf32> to vector<1x16xf32>
    %9 = vector.shape_cast %8 : vector<1x16xf32> to vector<1x1x16xf32>
    %cst_4 = arith.constant 6.400000e+01 : f32
    %10 = vector.broadcast %cst_4 : f32 to vector<1x1x16xf32>
    %11 = arith.divf %9, %10 : vector<1x1x16xf32>
    %cst_5 = arith.constant 9.99999974E-6 : f32
    %12 = vector.broadcast %cst_5 : f32 to vector<1x1x16xf32>
    %13 = arith.addf %11, %12 : vector<1x1x16xf32>
    %14 = math.rsqrt %13 : vector<1x1x16xf32>
    %15 = vector.broadcast %14 : vector<1x1x16xf32> to vector<1x64x16xf32>
    %16 = arith.mulf %6, %15 : vector<1x64x16xf32>
    %cst_6 = arith.constant 0.000000e+00 : f32
    %17 = vector.broadcast %cst_6 : f32 to vector<1x64x16xf32>
    %18 = arith.maximumf %16, %17 : vector<1x64x16xf32>
    %c0_7 = arith.constant 0 : index
    %c0_8 = arith.constant 0 : index
    %c0_9 = arith.constant 0 : index
    %19 = vector.load %arg3[%c0_7, %c0_8, %c0_9] : memref<1x64x16xf32, #tpu.memory_space<vmem>>, vector<1x64x16xf32>
    tpu.vector_store %arg3[%c0_7, %c0_8, %c0_9], %18 {strides = array<i32>} : memref<1x64x16xf32, #tpu.memory_space<vmem>>, vector<1x64x16xf32>,
    return
  }
  func.func @transform_0(%arg0: i32, %arg1: i32) -> (i32, i32, i32) {
    %c0_i32 = arith.constant 0 : i32
    %c0_i32_0 = arith.constant 0 : i32
    return %arg0, %c0_i32, %arg1 : i32, i32, i32
  }
  func.func @transform_1(%arg0: i32, %arg1: i32) -> (i32, i32, i32) {
    %c0_i32 = arith.constant 0 : i32
    %c0_i32_0 = arith.constant 0 : i32
    return %arg0, %c0_i32, %arg1 : i32, i32, i32
  }
}

module attributes {stable_mosaic.version = 11 : i64} {
  func.func @_conv_matmul_kernel(%arg0: i32, %arg1: i32, %arg2: i32, %arg3: memref<32x256xbf16, #tpu.memory_space<vmem>>, %arg4: memref<256x128xbf16, #tpu.memory_space<vmem>>, %arg5: memref<1x128xf32, #tpu.memory_space<vmem>>, %arg6: memref<32x128xf32, #tpu.memory_space<vmem>>, %arg7: memref<32x128xf32, #tpu.memory_space<vmem>>) attributes {dimension_semantics = [#tpu.dimension_semantics<parallel>, #tpu.dimension_semantics<parallel>, #tpu.dimension_semantics<arbitrary>], iteration_bounds = array<i64: 1, 1, 1>, scalar_prefetch = 0 : i64, scratch_operands = 1 : i64, tpu.core_type = #tpu.core_type<tc>, window_params = [{transform_indices = @transform_0, window_bounds = array<i64: 32, 256>}, {transform_indices = @transform_1, window_bounds = array<i64: 256, 128>}, {transform_indices = @transform_2, window_bounds = array<i64: 1, 128>}, {transform_indices = @transform_3, window_bounds = array<i64: 32, 128>}]} {
    %c0_i32 = arith.constant 0 : i32
    %0 = arith.cmpi eq, %arg2, %c0_i32 : i32
    %1 = arith.extui %0 : i1 to i32
    %c0_i32_0 = arith.constant 0 : i32
    %2 = arith.cmpi ne, %1, %c0_i32_0 : i32
    scf.if %2 {
      %cst_10 = arith.constant 0.000000e+00 : f32
      %12 = vector.broadcast %cst_10 : f32 to vector<32x128xf32>
      %c0_11 = arith.constant 0 : index
      %c0_12 = arith.constant 0 : index
      %13 = vector.load %arg7[%c0_11, %c0_12] : memref<32x128xf32, #tpu.memory_space<vmem>>, vector<32x128xf32>
      tpu.vector_store %arg7[%c0_11, %c0_12], %12 {strides = array<i32>} : memref<32x128xf32, #tpu.memory_space<vmem>>, vector<32x128xf32>,
    } else {
    }
    %c0 = arith.constant 0 : index
    %c0_1 = arith.constant 0 : index
    %3 = vector.load %arg7[%c0, %c0_1] : memref<32x128xf32, #tpu.memory_space<vmem>>, vector<32x128xf32>
    %c0_2 = arith.constant 0 : index
    %c0_3 = arith.constant 0 : index
    %4 = vector.load %arg3[%c0_2, %c0_3] : memref<32x256xbf16, #tpu.memory_space<vmem>>, vector<32x256xbf16>
    %c0_4 = arith.constant 0 : index
    %c0_5 = arith.constant 0 : index
    %5 = vector.load %arg4[%c0_4, %c0_5] : memref<256x128xbf16, #tpu.memory_space<vmem>>, vector<256x128xbf16>
    %cst = arith.constant dense<0.000000e+00> : vector<32x128xf32>
    %6 = tpu.matmul %4, %5, %cst {dimension_numbers = #tpu.dot_dimension_numbers<[1], [0], [0], [1], [0, 0, 1, 1], [], []>} : vector<32x256xbf16>, vector<256x128xbf16>, vector<32x128xf32> -> vector<32x128xf32>
    %7 = arith.addf %3, %6 : vector<32x128xf32>
    %c0_6 = arith.constant 0 : index
    %c0_7 = arith.constant 0 : index
    %8 = vector.load %arg7[%c0_6, %c0_7] : memref<32x128xf32, #tpu.memory_space<vmem>>, vector<32x128xf32>
    tpu.vector_store %arg7[%c0_6, %c0_7], %7 {strides = array<i32>} : memref<32x128xf32, #tpu.memory_space<vmem>>, vector<32x128xf32>,
    %c0_i32_8 = arith.constant 0 : i32
    %9 = arith.cmpi eq, %arg2, %c0_i32_8 : i32
    %10 = arith.extui %9 : i1 to i32
    %c0_i32_9 = arith.constant 0 : i32
    %11 = arith.cmpi ne, %10, %c0_i32_9 : i32
    scf.if %11 {
      %c0_10 = arith.constant 0 : index
      %c0_11 = arith.constant 0 : index
      %12 = vector.load %arg7[%c0_10, %c0_11] : memref<32x128xf32, #tpu.memory_space<vmem>>, vector<32x128xf32>
      %c0_12 = arith.constant 0 : index
      %c0_13 = arith.constant 0 : index
      %13 = vector.load %arg5[%c0_12, %c0_13] : memref<1x128xf32, #tpu.memory_space<vmem>>, vector<1x128xf32>
      %14 = vector.broadcast %13 : vector<1x128xf32> to vector<32x128xf32>
      %15 = arith.addf %12, %14 : vector<32x128xf32>
      %c0_14 = arith.constant 0 : index
      %c0_15 = arith.constant 0 : index
      %16 = vector.load %arg6[%c0_14, %c0_15] : memref<32x128xf32, #tpu.memory_space<vmem>>, vector<32x128xf32>
      tpu.vector_store %arg6[%c0_14, %c0_15], %15 {strides = array<i32>} : memref<32x128xf32, #tpu.memory_space<vmem>>, vector<32x128xf32>,
    } else {
    }
    return
  }
  func.func @transform_0(%arg0: i32, %arg1: i32, %arg2: i32) -> (i32, i32) {
    %c0_i32 = arith.constant 0 : i32
    return %arg0, %arg2 : i32, i32
  }
  func.func @transform_1(%arg0: i32, %arg1: i32, %arg2: i32) -> (i32, i32) {
    %c0_i32 = arith.constant 0 : i32
    return %arg2, %arg1 : i32, i32
  }
  func.func @transform_2(%arg0: i32, %arg1: i32, %arg2: i32) -> (i32, i32) {
    %c0_i32 = arith.constant 0 : i32
    %c0_i32_0 = arith.constant 0 : i32
    return %c0_i32, %arg1 : i32, i32
  }
  func.func @transform_3(%arg0: i32, %arg1: i32, %arg2: i32) -> (i32, i32) {
    %c0_i32 = arith.constant 0 : i32
    return %arg0, %arg1 : i32, i32
  }
}

module attributes {stable_mosaic.version = 11 : i64} {
  func.func @_instance_norm_kernel(%arg0: i32, %arg1: i32, %arg2: memref<1x16x32xf32, #tpu.memory_space<vmem>>, %arg3: memref<1x16x32xf32, #tpu.memory_space<vmem>>) attributes {dimension_semantics = [#tpu.dimension_semantics<parallel>, #tpu.dimension_semantics<parallel>], iteration_bounds = array<i64: 2, 1>, scalar_prefetch = 0 : i64, scratch_operands = 0 : i64, tpu.core_type = #tpu.core_type<tc>, window_params = [{transform_indices = @transform_0, window_bounds = array<i64: 1, 16, 32>}, {transform_indices = @transform_1, window_bounds = array<i64: 1, 16, 32>}]} {
    %c0 = arith.constant 0 : index
    %c0_0 = arith.constant 0 : index
    %c0_1 = arith.constant 0 : index
    %0 = vector.load %arg2[%c0, %c0_0, %c0_1] : memref<1x16x32xf32, #tpu.memory_space<vmem>>, vector<1x16x32xf32>
    %cst = arith.constant dense<0.000000e+00> : vector<1x32xf32>
    %1 = vector.multi_reduction <add>, %0, %cst [1] : vector<1x16x32xf32> to vector<1x32xf32>
    %2 = vector.shape_cast %1 : vector<1x32xf32> to vector<1x1x32xf32>
    %cst_2 = arith.constant 1.600000e+01 : f32
    %3 = vector.broadcast %cst_2 : f32 to vector<1x1x32xf32>
    %4 = arith.divf %2, %3 : vector<1x1x32xf32>
    %5 = vector.broadcast %4 : vector<1x1x32xf32> to vector<1x16x32xf32>
    %6 = arith.subf %0, %5 : vector<1x16x32xf32>
    %7 = arith.mulf %6, %6 : vector<1x16x32xf32>
    %cst_3 = arith.constant dense<0.000000e+00> : vector<1x32xf32>
    %8 = vector.multi_reduction <add>, %7, %cst_3 [1] : vector<1x16x32xf32> to vector<1x32xf32>
    %9 = vector.shape_cast %8 : vector<1x32xf32> to vector<1x1x32xf32>
    %cst_4 = arith.constant 1.600000e+01 : f32
    %10 = vector.broadcast %cst_4 : f32 to vector<1x1x32xf32>
    %11 = arith.divf %9, %10 : vector<1x1x32xf32>
    %cst_5 = arith.constant 9.99999974E-6 : f32
    %12 = vector.broadcast %cst_5 : f32 to vector<1x1x32xf32>
    %13 = arith.addf %11, %12 : vector<1x1x32xf32>
    %14 = math.rsqrt %13 : vector<1x1x32xf32>
    %15 = vector.broadcast %14 : vector<1x1x32xf32> to vector<1x16x32xf32>
    %16 = arith.mulf %6, %15 : vector<1x16x32xf32>
    %cst_6 = arith.constant 0.000000e+00 : f32
    %17 = vector.broadcast %cst_6 : f32 to vector<1x16x32xf32>
    %18 = arith.maximumf %16, %17 : vector<1x16x32xf32>
    %c0_7 = arith.constant 0 : index
    %c0_8 = arith.constant 0 : index
    %c0_9 = arith.constant 0 : index
    %19 = vector.load %arg3[%c0_7, %c0_8, %c0_9] : memref<1x16x32xf32, #tpu.memory_space<vmem>>, vector<1x16x32xf32>
    tpu.vector_store %arg3[%c0_7, %c0_8, %c0_9], %18 {strides = array<i32>} : memref<1x16x32xf32, #tpu.memory_space<vmem>>, vector<1x16x32xf32>,
    return
  }
  func.func @transform_0(%arg0: i32, %arg1: i32) -> (i32, i32, i32) {
    %c0_i32 = arith.constant 0 : i32
    %c0_i32_0 = arith.constant 0 : i32
    return %arg0, %c0_i32, %arg1 : i32, i32, i32
  }
  func.func @transform_1(%arg0: i32, %arg1: i32) -> (i32, i32, i32) {
    %c0_i32 = arith.constant 0 : i32
    %c0_i32_0 = arith.constant 0 : i32
    return %arg0, %c0_i32, %arg1 : i32, i32, i32
  }
}

module attributes {stable_mosaic.version = 11 : i64} {
  func.func @_conv_matmul_kernel(%arg0: i32, %arg1: i32, %arg2: i32, %arg3: memref<32x384xbf16, #tpu.memory_space<vmem>>, %arg4: memref<384x128xbf16, #tpu.memory_space<vmem>>, %arg5: memref<1x128xf32, #tpu.memory_space<vmem>>, %arg6: memref<32x128xf32, #tpu.memory_space<vmem>>, %arg7: memref<32x128xf32, #tpu.memory_space<vmem>>) attributes {dimension_semantics = [#tpu.dimension_semantics<parallel>, #tpu.dimension_semantics<parallel>, #tpu.dimension_semantics<arbitrary>], iteration_bounds = array<i64: 1, 1, 1>, scalar_prefetch = 0 : i64, scratch_operands = 1 : i64, tpu.core_type = #tpu.core_type<tc>, window_params = [{transform_indices = @transform_0, window_bounds = array<i64: 32, 384>}, {transform_indices = @transform_1, window_bounds = array<i64: 384, 128>}, {transform_indices = @transform_2, window_bounds = array<i64: 1, 128>}, {transform_indices = @transform_3, window_bounds = array<i64: 32, 128>}]} {
    %c0_i32 = arith.constant 0 : i32
    %0 = arith.cmpi eq, %arg2, %c0_i32 : i32
    %1 = arith.extui %0 : i1 to i32
    %c0_i32_0 = arith.constant 0 : i32
    %2 = arith.cmpi ne, %1, %c0_i32_0 : i32
    scf.if %2 {
      %cst_10 = arith.constant 0.000000e+00 : f32
      %12 = vector.broadcast %cst_10 : f32 to vector<32x128xf32>
      %c0_11 = arith.constant 0 : index
      %c0_12 = arith.constant 0 : index
      %13 = vector.load %arg7[%c0_11, %c0_12] : memref<32x128xf32, #tpu.memory_space<vmem>>, vector<32x128xf32>
      tpu.vector_store %arg7[%c0_11, %c0_12], %12 {strides = array<i32>} : memref<32x128xf32, #tpu.memory_space<vmem>>, vector<32x128xf32>,
    } else {
    }
    %c0 = arith.constant 0 : index
    %c0_1 = arith.constant 0 : index
    %3 = vector.load %arg7[%c0, %c0_1] : memref<32x128xf32, #tpu.memory_space<vmem>>, vector<32x128xf32>
    %c0_2 = arith.constant 0 : index
    %c0_3 = arith.constant 0 : index
    %4 = vector.load %arg3[%c0_2, %c0_3] : memref<32x384xbf16, #tpu.memory_space<vmem>>, vector<32x384xbf16>
    %c0_4 = arith.constant 0 : index
    %c0_5 = arith.constant 0 : index
    %5 = vector.load %arg4[%c0_4, %c0_5] : memref<384x128xbf16, #tpu.memory_space<vmem>>, vector<384x128xbf16>
    %cst = arith.constant dense<0.000000e+00> : vector<32x128xf32>
    %6 = tpu.matmul %4, %5, %cst {dimension_numbers = #tpu.dot_dimension_numbers<[1], [0], [0], [1], [0, 0, 1, 1], [], []>} : vector<32x384xbf16>, vector<384x128xbf16>, vector<32x128xf32> -> vector<32x128xf32>
    %7 = arith.addf %3, %6 : vector<32x128xf32>
    %c0_6 = arith.constant 0 : index
    %c0_7 = arith.constant 0 : index
    %8 = vector.load %arg7[%c0_6, %c0_7] : memref<32x128xf32, #tpu.memory_space<vmem>>, vector<32x128xf32>
    tpu.vector_store %arg7[%c0_6, %c0_7], %7 {strides = array<i32>} : memref<32x128xf32, #tpu.memory_space<vmem>>, vector<32x128xf32>,
    %c0_i32_8 = arith.constant 0 : i32
    %9 = arith.cmpi eq, %arg2, %c0_i32_8 : i32
    %10 = arith.extui %9 : i1 to i32
    %c0_i32_9 = arith.constant 0 : i32
    %11 = arith.cmpi ne, %10, %c0_i32_9 : i32
    scf.if %11 {
      %c0_10 = arith.constant 0 : index
      %c0_11 = arith.constant 0 : index
      %12 = vector.load %arg7[%c0_10, %c0_11] : memref<32x128xf32, #tpu.memory_space<vmem>>, vector<32x128xf32>
      %c0_12 = arith.constant 0 : index
      %c0_13 = arith.constant 0 : index
      %13 = vector.load %arg5[%c0_12, %c0_13] : memref<1x128xf32, #tpu.memory_space<vmem>>, vector<1x128xf32>
      %14 = vector.broadcast %13 : vector<1x128xf32> to vector<32x128xf32>
      %15 = arith.addf %12, %14 : vector<32x128xf32>
      %c0_14 = arith.constant 0 : index
      %c0_15 = arith.constant 0 : index
      %16 = vector.load %arg6[%c0_14, %c0_15] : memref<32x128xf32, #tpu.memory_space<vmem>>, vector<32x128xf32>
      tpu.vector_store %arg6[%c0_14, %c0_15], %15 {strides = array<i32>} : memref<32x128xf32, #tpu.memory_space<vmem>>, vector<32x128xf32>,
    } else {
    }
    return
  }
  func.func @transform_0(%arg0: i32, %arg1: i32, %arg2: i32) -> (i32, i32) {
    %c0_i32 = arith.constant 0 : i32
    return %arg0, %arg2 : i32, i32
  }
  func.func @transform_1(%arg0: i32, %arg1: i32, %arg2: i32) -> (i32, i32) {
    %c0_i32 = arith.constant 0 : i32
    return %arg2, %arg1 : i32, i32
  }
  func.func @transform_2(%arg0: i32, %arg1: i32, %arg2: i32) -> (i32, i32) {
    %c0_i32 = arith.constant 0 : i32
    %c0_i32_0 = arith.constant 0 : i32
    return %c0_i32, %arg1 : i32, i32
  }
  func.func @transform_3(%arg0: i32, %arg1: i32, %arg2: i32) -> (i32, i32) {
    %c0_i32 = arith.constant 0 : i32
    return %arg0, %arg1 : i32, i32
  }
}

module attributes {stable_mosaic.version = 11 : i64} {
  func.func @_instance_norm_kernel(%arg0: i32, %arg1: i32, %arg2: memref<1x16x32xf32, #tpu.memory_space<vmem>>, %arg3: memref<1x16x32xf32, #tpu.memory_space<vmem>>, %arg4: memref<1x16x32xf32, #tpu.memory_space<vmem>>) attributes {dimension_semantics = [#tpu.dimension_semantics<parallel>, #tpu.dimension_semantics<parallel>], iteration_bounds = array<i64: 2, 1>, scalar_prefetch = 0 : i64, scratch_operands = 0 : i64, tpu.core_type = #tpu.core_type<tc>, window_params = [{transform_indices = @transform_0, window_bounds = array<i64: 1, 16, 32>}, {transform_indices = @transform_1, window_bounds = array<i64: 1, 16, 32>}, {transform_indices = @transform_2, window_bounds = array<i64: 1, 16, 32>}]} {
    %c0 = arith.constant 0 : index
    %c0_0 = arith.constant 0 : index
    %c0_1 = arith.constant 0 : index
    %0 = vector.load %arg2[%c0, %c0_0, %c0_1] : memref<1x16x32xf32, #tpu.memory_space<vmem>>, vector<1x16x32xf32>
    %cst = arith.constant dense<0.000000e+00> : vector<1x32xf32>
    %1 = vector.multi_reduction <add>, %0, %cst [1] : vector<1x16x32xf32> to vector<1x32xf32>
    %2 = vector.shape_cast %1 : vector<1x32xf32> to vector<1x1x32xf32>
    %cst_2 = arith.constant 1.600000e+01 : f32
    %3 = vector.broadcast %cst_2 : f32 to vector<1x1x32xf32>
    %4 = arith.divf %2, %3 : vector<1x1x32xf32>
    %5 = vector.broadcast %4 : vector<1x1x32xf32> to vector<1x16x32xf32>
    %6 = arith.subf %0, %5 : vector<1x16x32xf32>
    %7 = arith.mulf %6, %6 : vector<1x16x32xf32>
    %cst_3 = arith.constant dense<0.000000e+00> : vector<1x32xf32>
    %8 = vector.multi_reduction <add>, %7, %cst_3 [1] : vector<1x16x32xf32> to vector<1x32xf32>
    %9 = vector.shape_cast %8 : vector<1x32xf32> to vector<1x1x32xf32>
    %cst_4 = arith.constant 1.600000e+01 : f32
    %10 = vector.broadcast %cst_4 : f32 to vector<1x1x32xf32>
    %11 = arith.divf %9, %10 : vector<1x1x32xf32>
    %cst_5 = arith.constant 9.99999974E-6 : f32
    %12 = vector.broadcast %cst_5 : f32 to vector<1x1x32xf32>
    %13 = arith.addf %11, %12 : vector<1x1x32xf32>
    %14 = math.rsqrt %13 : vector<1x1x32xf32>
    %15 = vector.broadcast %14 : vector<1x1x32xf32> to vector<1x16x32xf32>
    %16 = arith.mulf %6, %15 : vector<1x16x32xf32>
    %c0_6 = arith.constant 0 : index
    %c0_7 = arith.constant 0 : index
    %c0_8 = arith.constant 0 : index
    %17 = vector.load %arg3[%c0_6, %c0_7, %c0_8] : memref<1x16x32xf32, #tpu.memory_space<vmem>>, vector<1x16x32xf32>
    %18 = arith.addf %17, %16 : vector<1x16x32xf32>
    %c0_9 = arith.constant 0 : index
    %c0_10 = arith.constant 0 : index
    %c0_11 = arith.constant 0 : index
    %19 = vector.load %arg4[%c0_9, %c0_10, %c0_11] : memref<1x16x32xf32, #tpu.memory_space<vmem>>, vector<1x16x32xf32>
    tpu.vector_store %arg4[%c0_9, %c0_10, %c0_11], %18 {strides = array<i32>} : memref<1x16x32xf32, #tpu.memory_space<vmem>>, vector<1x16x32xf32>,
    return
  }
  func.func @transform_0(%arg0: i32, %arg1: i32) -> (i32, i32, i32) {
    %c0_i32 = arith.constant 0 : i32
    %c0_i32_0 = arith.constant 0 : i32
    return %arg0, %c0_i32, %arg1 : i32, i32, i32
  }
  func.func @transform_1(%arg0: i32, %arg1: i32) -> (i32, i32, i32) {
    %c0_i32 = arith.constant 0 : i32
    %c0_i32_0 = arith.constant 0 : i32
    return %arg0, %c0_i32, %arg1 : i32, i32, i32
  }
  func.func @transform_2(%arg0: i32, %arg1: i32) -> (i32, i32, i32) {
    %c0_i32 = arith.constant 0 : i32
    %c0_i32_0 = arith.constant 0 : i32
    return %arg0, %c0_i32, %arg1 : i32, i32, i32
  }
}

module attributes {stable_mosaic.version = 11 : i64} {
  func.func @_instance_norm_kernel(%arg0: i32, %arg1: i32, %arg2: memref<1x16x32xf32, #tpu.memory_space<vmem>>, %arg3: memref<1x16x32xf32, #tpu.memory_space<vmem>>, %arg4: memref<1x16x32xf32, #tpu.memory_space<vmem>>, %arg5: memref<1x16x32xf32, #tpu.memory_space<vmem>>, %arg6: memref<1x16x32xf32, #tpu.memory_space<vmem>>) attributes {dimension_semantics = [#tpu.dimension_semantics<parallel>, #tpu.dimension_semantics<parallel>], iteration_bounds = array<i64: 2, 1>, scalar_prefetch = 0 : i64, scratch_operands = 0 : i64, tpu.core_type = #tpu.core_type<tc>, window_params = [{transform_indices = @transform_0, window_bounds = array<i64: 1, 16, 32>}, {transform_indices = @transform_1, window_bounds = array<i64: 1, 16, 32>}, {transform_indices = @transform_2, window_bounds = array<i64: 1, 16, 32>}, {transform_indices = @transform_3, window_bounds = array<i64: 1, 16, 32>}, {transform_indices = @transform_4, window_bounds = array<i64: 1, 16, 32>}]} {
    %c0 = arith.constant 0 : index
    %c0_0 = arith.constant 0 : index
    %c0_1 = arith.constant 0 : index
    %0 = vector.load %arg2[%c0, %c0_0, %c0_1] : memref<1x16x32xf32, #tpu.memory_space<vmem>>, vector<1x16x32xf32>
    %cst = arith.constant dense<0.000000e+00> : vector<1x32xf32>
    %1 = vector.multi_reduction <add>, %0, %cst [1] : vector<1x16x32xf32> to vector<1x32xf32>
    %2 = vector.shape_cast %1 : vector<1x32xf32> to vector<1x1x32xf32>
    %cst_2 = arith.constant 1.600000e+01 : f32
    %3 = vector.broadcast %cst_2 : f32 to vector<1x1x32xf32>
    %4 = arith.divf %2, %3 : vector<1x1x32xf32>
    %5 = vector.broadcast %4 : vector<1x1x32xf32> to vector<1x16x32xf32>
    %6 = arith.subf %0, %5 : vector<1x16x32xf32>
    %7 = arith.mulf %6, %6 : vector<1x16x32xf32>
    %cst_3 = arith.constant dense<0.000000e+00> : vector<1x32xf32>
    %8 = vector.multi_reduction <add>, %7, %cst_3 [1] : vector<1x16x32xf32> to vector<1x32xf32>
    %9 = vector.shape_cast %8 : vector<1x32xf32> to vector<1x1x32xf32>
    %cst_4 = arith.constant 1.600000e+01 : f32
    %10 = vector.broadcast %cst_4 : f32 to vector<1x1x32xf32>
    %11 = arith.divf %9, %10 : vector<1x1x32xf32>
    %cst_5 = arith.constant 9.99999974E-6 : f32
    %12 = vector.broadcast %cst_5 : f32 to vector<1x1x32xf32>
    %13 = arith.addf %11, %12 : vector<1x1x32xf32>
    %14 = math.rsqrt %13 : vector<1x1x32xf32>
    %15 = vector.broadcast %14 : vector<1x1x32xf32> to vector<1x16x32xf32>
    %16 = arith.mulf %6, %15 : vector<1x16x32xf32>
    %c0_6 = arith.constant 0 : index
    %c0_7 = arith.constant 0 : index
    %c0_8 = arith.constant 0 : index
    %17 = vector.load %arg3[%c0_6, %c0_7, %c0_8] : memref<1x16x32xf32, #tpu.memory_space<vmem>>, vector<1x16x32xf32>
    %18 = arith.addf %17, %16 : vector<1x16x32xf32>
    %c0_9 = arith.constant 0 : index
    %c0_10 = arith.constant 0 : index
    %c0_11 = arith.constant 0 : index
    %19 = vector.load %arg5[%c0_9, %c0_10, %c0_11] : memref<1x16x32xf32, #tpu.memory_space<vmem>>, vector<1x16x32xf32>
    tpu.vector_store %arg5[%c0_9, %c0_10, %c0_11], %18 {strides = array<i32>} : memref<1x16x32xf32, #tpu.memory_space<vmem>>, vector<1x16x32xf32>,
    %c0_12 = arith.constant 0 : index
    %c0_13 = arith.constant 0 : index
    %c0_14 = arith.constant 0 : index
    %20 = vector.load %arg4[%c0_12, %c0_13, %c0_14] : memref<1x16x32xf32, #tpu.memory_space<vmem>>, vector<1x16x32xf32>
    %21 = arith.addf %18, %20 : vector<1x16x32xf32>
    %c0_15 = arith.constant 0 : index
    %c0_16 = arith.constant 0 : index
    %c0_17 = arith.constant 0 : index
    %22 = vector.load %arg6[%c0_15, %c0_16, %c0_17] : memref<1x16x32xf32, #tpu.memory_space<vmem>>, vector<1x16x32xf32>
    tpu.vector_store %arg6[%c0_15, %c0_16, %c0_17], %21 {strides = array<i32>} : memref<1x16x32xf32, #tpu.memory_space<vmem>>, vector<1x16x32xf32>,
    return
  }
  func.func @transform_0(%arg0: i32, %arg1: i32) -> (i32, i32, i32) {
    %c0_i32 = arith.constant 0 : i32
    %c0_i32_0 = arith.constant 0 : i32
    return %arg0, %c0_i32, %arg1 : i32, i32, i32
  }
  func.func @transform_1(%arg0: i32, %arg1: i32) -> (i32, i32, i32) {
    %c0_i32 = arith.constant 0 : i32
    %c0_i32_0 = arith.constant 0 : i32
    return %arg0, %c0_i32, %arg1 : i32, i32, i32
  }
  func.func @transform_2(%arg0: i32, %arg1: i32) -> (i32, i32, i32) {
    %c0_i32 = arith.constant 0 : i32
    %c0_i32_0 = arith.constant 0 : i32
    return %arg0, %c0_i32, %arg1 : i32, i32, i32
  }
  func.func @transform_3(%arg0: i32, %arg1: i32) -> (i32, i32, i32) {
    %c0_i32 = arith.constant 0 : i32
    %c0_i32_0 = arith.constant 0 : i32
    return %arg0, %c0_i32, %arg1 : i32, i32, i32
  }
  func.func @transform_4(%arg0: i32, %arg1: i32) -> (i32, i32, i32) {
    %c0_i32 = arith.constant 0 : i32
    %c0_i32_0 = arith.constant 0 : i32
    return %arg0, %c0_i32, %arg1 : i32, i32, i32
  }
}

</mosaic_0001>

<bundles_post_ra>
// kernel: encoder_forward.23
= control target key start
LH: loop header
LB: loop body
LE: loop exit
PB: predicated region body
PF: predicated region fallthrough
CT: control target
= control target key end

     0   :  { %s704_s6 = smov 0   ;;  %s706_s7 = smov 0   ;;  %s1264_s0 = inlined_call_operand.vmem [shape: f32[2,256,8], index: 0, kind: input, shape index: {}]   ;;  %s1265_s1 = inlined_call_operand.vmem [shape: f32[2,256,8], index: 1, kind: output, shape index: {}]  }
   0x1   :  { %s708_s8 = smov 0  }
   0x2 LB: > { %s23_s9 = sadd.s32 1, %s688_s7  ;;  %p635_p0 = scmp.ge.s32.totalorder %s692_s8, 1  ;;  %s692_s8 = sphi %s708_s8, %s11_s8   ;;  %s688_s7 = sphi %s706_s7, %s1267_s7   ;;  %s684_s6 = sphi %s704_s6, %s1266_s6  }
   0x3   : > { %p25_p1 = scmp.ge.s32.totalorder %s23_s9, 2  ;;  %p106_p2 = scmp.lt.s32.totalorder %s692_s8, 3 }
   0x5   : > { %s1269_s9 = smov (%p25_p1, %s23_s9), 0  ;;  %p107_p3 = pnand %p635_p0, %p106_p2 }
   0x6   : > { %p132_p4 = scmp.lt.s32.totalorder (!%p107_p3), %s684_s6, 1  ;;  %vm180_vm0 = vcmask (!%p107_p3), 64512  }
   0x7   : > { %110 = sbr.rel (%p107_p3) target bundleno = 224 (0xe0), region = 24 }
   0xe   : > { %s1271_s6 = smov (!%p132_p4, %s684_s6), 1 }
   0xf   : > { %s642_s10 = sshll.u32 %s1271_s6, 8 }
  0x10   : > { %s730_s13 = scalar_lea.vmem %s1264_s0, %s642_s10  ;;  %s1141_s16 = scalar_lea.vmem %s1265_s1, %s642_s10 }
  0x11   : > { %v733_v0 = vld [vmem:[%s730_s13] sm:$0xff]  ;;  %v736_v1 = vld [vmem:[%s730_s13 + $0x8] sm:$0xff]  ;;  %v739_v2 = vld [vmem:[%s730_s13 + $0x10] sm:$0xff] }
  0x12   : > { %v742_v3 = vld [vmem:[%s730_s13 + $0x18] sm:$0xff]  ;;  %v181_v4 = vsel %vm180_vm0, %v733_v0, 0.0  ;;  %v182_v5 = vsel %vm180_vm0, %v736_v1, 0.0  ;;  %v184_v6 = vsel %vm180_vm0, %v739_v2, 0.0  ;;  %v751_v7 = vld [vmem:[%s730_s13 + $0x20] sm:$0xff]  ;;  %v756_v10 = vld [vmem:[%s730_s13 + $0x28] sm:$0xff] }
  0x13   : > { %v183_v8 = vadd.f32 %v182_v5, %v181_v4  ;;  %v186_v9 = vsel %vm180_vm0, %v742_v3, 0.0  ;;  %v188_v12 = vsel %vm180_vm0, %v751_v7, 0.0  ;;  %v761_v13 = vld [vmem:[%s730_s13 + $0x30] sm:$0xff]  ;;  %v190_v15 = vsel %vm180_vm0, %v756_v10, 0.0  ;;  %v766_v16 = vld [vmem:[%s730_s13 + $0x38] sm:$0xff]  ;;  %v771_v19 = vld [vmem:[%s730_s13 + $0x40] sm:$0xff] }
  0x14   : > { %v192_v18 = vsel %vm180_vm0, %v761_v13, 0.0  ;;  %v194_v21 = vsel %vm180_vm0, %v766_v16, 0.0  ;;  %v776_v22 = vld [vmem:[%s730_s13 + $0x48] sm:$0xff]  ;;  %v196_v24 = vsel %vm180_vm0, %v771_v19, 0.0  ;;  %v781_v25 = vld [vmem:[%s730_s13 + $0x50] sm:$0xff]  ;;  %v786_v28 = vld [vmem:[%s730_s13 + $0x58] sm:$0xff] }
  0x15   : > { %v185_v11 = vadd.f32 %v184_v6, %v183_v8  ;;  %v198_v27 = vsel %vm180_vm0, %v776_v22, 0.0  ;;  %v200_v30 = vsel %vm180_vm0, %v781_v25, 0.0  ;;  %v791_v31 = vld [vmem:[%s730_s13 + $0x60] sm:$0xff]  ;;  %v202_v33 = vsel %vm180_vm0, %v786_v28, 0.0  ;;  %v796_v34 = vld [vmem:[%s730_s13 + $0x68] sm:$0xff]  ;;  %v801_v37 = vld [vmem:[%s730_s13 + $0x70] sm:$0xff] }
  0x16   : > { %v204_v36 = vsel %vm180_vm0, %v791_v31, 0.0  ;;  %v206_v39 = vsel %vm180_vm0, %v796_v34, 0.0  ;;  %v806_v40 = vld [vmem:[%s730_s13 + $0x78] sm:$0xff]  ;;  %v208_v42 = vsel %vm180_vm0, %v801_v37, 0.0  ;;  %v811_v43 = vld [vmem:[%s730_s13 + $0x80] sm:$0xff]  ;;  %v816_v46 = vld [vmem:[%s730_s13 + $0x88] sm:$0xff] }
  0x17   : > { %v187_v14 = vadd.f32 %v186_v9, %v185_v11  ;;  %v210_v45 = vsel %vm180_vm0, %v806_v40, 0.0  ;;  %v212_v48 = vsel %vm180_vm0, %v811_v43, 0.0  ;;  %v821_v49 = vld [vmem:[%s730_s13 + $0x90] sm:$0xff]  ;;  %v214_v51 = vsel %vm180_vm0, %v816_v46, 0.0  ;;  %v826_v52 = vld [vmem:[%s730_s13 + $0x98] sm:$0xff]  ;;  %v831_v55 = vld [vmem:[%s730_s13 + $0xa0] sm:$0xff] }
  0x18   : > { %v216_v54 = vsel %vm180_vm0, %v821_v49, 0.0  ;;  %v218_v57 = vsel %vm180_vm0, %v826_v52, 0.0  ;;  %v836_v58 = vld [vmem:[%s730_s13 + $0xa8] sm:$0xff]  ;;  %v220_v60 = vsel %vm180_vm0, %v831_v55, 0.0  ;;  %v841_v61 = vld [vmem:[%s730_s13 + $0xb0] sm:$0xff]  ;;  %v846_v4 = vld [vmem:[%s730_s13 + $0xb8] sm:$0xff] }
  0x19   : > { %v189_v17 = vadd.f32 %v188_v12, %v187_v14  ;;  %v222_v63 = vsel %vm180_vm0, %v836_v58, 0.0  ;;  %v224_v6 = vsel %vm180_vm0, %v841_v61, 0.0  ;;  %v851_v8 = vld [vmem:[%s730_s13 + $0xc0] sm:$0xff]  ;;  %v226_v11 = vsel %vm180_vm0, %v846_v4, 0.0  ;;  %v856_v12 = vld [vmem:[%s730_s13 + $0xc8] sm:$0xff] }
  0x1b   : > { %v191_v20 = vadd.f32 %v190_v15, %v189_v17  ;;  %v228_v15 = vsel %vm180_vm0, %v851_v8, 0.0  ;;  %v861_v17 = vld [vmem:[%s730_s13 + $0xd0] sm:$0xff] }
  0x1d   : > { %v193_v23 = vadd.f32 %v192_v18, %v191_v20  ;;  %v230_v20 = vsel %vm180_vm0, %v856_v12, 0.0 }
  0x1f   : > { %v195_v26 = vadd.f32 %v194_v21, %v193_v23  ;;  %v866_v21 = vld [vmem:[%s730_s13 + $0xd8] sm:$0xff] }
  0x21   : > { %v197_v29 = vadd.f32 %v196_v24, %v195_v26  ;;  %v232_v24 = vsel %vm180_vm0, %v861_v17, 0.0  ;;  %v871_v26 = vld [vmem:[%s730_s13 + $0xe0] sm:$0xff] }
  0x23   : > { %v199_v32 = vadd.f32 %v198_v27, %v197_v29  ;;  %v234_v29 = vsel %vm180_vm0, %v866_v21, 0.0 }
  0x25   : > { %v201_v35 = vadd.f32 %v200_v30, %v199_v32  ;;  %v876_v30 = vld [vmem:[%s730_s13 + $0xe8] sm:$0xff] }
  0x27   : > { %v203_v38 = vadd.f32 %v202_v33, %v201_v35  ;;  %v236_v33 = vsel %vm180_vm0, %v871_v26, 0.0  ;;  %v881_v35 = vld [vmem:[%s730_s13 + $0xf0] sm:$0xff] }
  0x29   : > { %v205_v41 = vadd.f32 %v204_v36, %v203_v38  ;;  %v238_v38 = vsel %vm180_vm0, %v876_v30, 0.0 }
  0x2b   : > { %v207_v44 = vadd.f32 %v206_v39, %v205_v41  ;;  %v886_v39 = vld [vmem:[%s730_s13 + $0xf8] sm:$0xff] }
  0x2d   : > { %v209_v47 = vadd.f32 %v208_v42, %v207_v44  ;;  %v240_v42 = vsel %vm180_vm0, %v881_v35, 0.0 }
  0x2f   : > { %v211_v50 = vadd.f32 %v210_v45, %v209_v47  ;;  %v242_v45 = vsel %vm180_vm0, %v886_v39, 0.0 }
  0x31   : > { %v213_v53 = vadd.f32 %v212_v48, %v211_v50 }
  0x33   : > { %v215_v56 = vadd.f32 %v214_v51, %v213_v53 }
  0x35   : > { %v217_v59 = vadd.f32 %v216_v54, %v215_v56 }
  0x37   : > { %v219_v62 = vadd.f32 %v218_v57, %v217_v59 }
  0x39   : > { %v221_v5 = vadd.f32 %v220_v60, %v219_v62 }
  0x3b   : > { %v223_v9 = vadd.f32 %v222_v63, %v221_v5 }
  0x3d   : > { %v225_v14 = vadd.f32 %v224_v6, %v223_v9 }
  0x3f   : > { %v227_v18 = vadd.f32 %v226_v11, %v225_v14 }
  0x41   : > { %v229_v23 = vadd.f32 %v228_v15, %v227_v18 }
  0x43   : > { %v231_v27 = vadd.f32 %v230_v20, %v229_v23 }
  0x45   : > { %v233_v32 = vadd.f32 %v232_v24, %v231_v27 }
  0x47   : > { %v235_v36 = vadd.f32 %v234_v29, %v233_v32 }
  0x49   : > { %v237_v41 = vadd.f32 %v236_v33, %v235_v36 }
  0x4b   : > { %v239_v44 = vadd.f32 %v238_v38, %v237_v41 }
  0x4d   : > { %v241_v47 = vadd.f32 %v240_v42, %v239_v44 }
  0x4f   : > { %v243_v48 = vadd.f32 %v242_v45, %v241_v47 }
  0x51   : > { %v244_v50 = vrot.slane %v243_v48, 4 }
  0x53   : > { %v245_v51 = vadd.f32 %v244_v50, %v243_v48 }
  0x55   : > { %v246_v53 = vrot.slane %v245_v51, 2 }
  0x57   : > { %v247_v54 = vadd.f32 %v246_v53, %v245_v51 }
  0x59   : > { %v248_v56 = vrot.slane %v247_v54, 1 }
  0x5b   : > { %v249_v57 = vadd.f32 %v248_v56, %v247_v54 }
  0x5d   : > { %v892_v59 = vmul.f32 0.00390625, %v249_v57 }
  0x5f   : > { %v896_v60 = vsub.f32 %v733_v0, %v892_v59  ;;  %v900_v62 = vsub.f32 %v736_v1, %v892_v59  ;;  %v904_v63 = vsub.f32 %v739_v2, %v892_v59  ;;  %v908_v5 = vsub.f32 %v742_v3, %v892_v59 }
  0x60   : > { %v912_v6 = vsub.f32 %v751_v7, %v892_v59  ;;  %v922_v2 = vsub.f32 %v756_v10, %v892_v59  ;;  %v928_v7 = vsub.f32 %v761_v13, %v892_v59  ;;  %v937_v10 = vsub.f32 %v766_v16, %v892_v59 }
  0x61   : > { %v284_v0 = vmul.f32 %v896_v60, %v896_v60  ;;  %v285_v9 = vmul.f32 %v900_v62, %v900_v62  ;;  %v286_v1 = vmul.f32 %v904_v63, %v904_v63  ;;  %v287_v3 = vmul.f32 %v908_v5, %v908_v5 }
  0x62   : > { %v288_v11 = vmul.f32 %v912_v6, %v912_v6  ;;  %v289_v23 = vmul.f32 %v922_v2, %v922_v2  ;;  %v944_v27 = vsub.f32 %v771_v19, %v892_v59  ;;  %v290_v29 = vmul.f32 %v928_v7, %v928_v7 }
  0x63   : > { %v316_v14 = vsel %vm180_vm0, %v284_v0, 0.0  ;;  %v317_v15 = vsel %vm180_vm0, %v285_v9, 0.0  ;;  %v319_v18 = vsel %vm180_vm0, %v286_v1, 0.0  ;;  %v321_v13 = vsel %vm180_vm0, %v287_v3, 0.0 }
  0x64   : > { %v318_v20 = vadd.f32 %v317_v15, %v316_v14  ;;  %v323_v32 = vsel %vm180_vm0, %v288_v11, 0.0  ;;  %v951_v16 = vsub.f32 %v776_v22, %v892_v59  ;;  %v291_v36 = vmul.f32 %v937_v10, %v937_v10 }
  0x65   : > { %v325_v38 = vsel %vm180_vm0, %v289_v23, 0.0  ;;  %v958_v19 = vsub.f32 %v781_v25, %v892_v59  ;;  %v292_v42 = vmul.f32 %v944_v27, %v944_v27  ;;  %v327_v44 = vsel %vm180_vm0, %v290_v29, 0.0 }
  0x66   : > { %v320_v24 = vadd.f32 %v319_v18, %v318_v20  ;;  %v965_v22 = vsub.f32 %v786_v28, %v892_v59  ;;  %v293_v47 = vmul.f32 %v951_v16, %v951_v16  ;;  %v329_v48 = vsel %vm180_vm0, %v291_v36, 0.0 }
  0x67   : > { %v972_v25 = vsub.f32 %v791_v31, %v892_v59  ;;  %v294_v51 = vmul.f32 %v958_v19, %v958_v19  ;;  %v331_v53 = vsel %vm180_vm0, %v292_v42, 0.0  ;;  %v979_v28 = vsub.f32 %v796_v34, %v892_v59 }
  0x68   : > { %v322_v33 = vadd.f32 %v321_v13, %v320_v24  ;;  %v295_v56 = vmul.f32 %v965_v22, %v965_v22  ;;  %v333_v57 = vsel %vm180_vm0, %v293_v47, 0.0  ;;  %v986_v31 = vsub.f32 %v801_v37, %v892_v59 }
  0x69   : > { %v296_v9 = vmul.f32 %v972_v25, %v972_v25  ;;  %v335_v1 = vsel %vm180_vm0, %v294_v51, 0.0  ;;  %v993_v34 = vsub.f32 %v806_v40, %v892_v59  ;;  %v297_v11 = vmul.f32 %v979_v28, %v979_v28 }
  0x6a   : > { %v324_v41 = vadd.f32 %v323_v32, %v322_v33  ;;  %v337_v14 = vsel %vm180_vm0, %v295_v56, 0.0  ;;  %v1000_v37 = vsub.f32 %v811_v43, %v892_v59  ;;  %v298_v18 = vmul.f32 %v986_v31, %v986_v31 }
  0x6b   : > { %v339_v20 = vsel %vm180_vm0, %v296_v9, 0.0  ;;  %v1007_v40 = vsub.f32 %v816_v46, %v892_v59  ;;  %v299_v13 = vmul.f32 %v993_v34, %v993_v34  ;;  %v341_v24 = vsel %vm180_vm0, %v297_v11, 0.0 }
  0x6c   : > { %v326_v45 = vadd.f32 %v325_v38, %v324_v41  ;;  %v1014_v43 = vsub.f32 %v821_v49, %v892_v59  ;;  %v300_v32 = vmul.f32 %v1000_v37, %v1000_v37  ;;  %v343_v33 = vsel %vm180_vm0, %v298_v18, 0.0 }
  0x6d   : > { %v1021_v46 = vsub.f32 %v826_v52, %v892_v59  ;;  %v301_v38 = vmul.f32 %v1007_v40, %v1007_v40  ;;  %v345_v41 = vsel %vm180_vm0, %v299_v13, 0.0  ;;  %v1028_v49 = vsub.f32 %v831_v55, %v892_v59 }
  0x6e   : > { %v328_v50 = vadd.f32 %v327_v44, %v326_v45  ;;  %v302_v44 = vmul.f32 %v1014_v43, %v1014_v43  ;;  %v347_v45 = vsel %vm180_vm0, %v300_v32, 0.0  ;;  %v1035_v52 = vsub.f32 %v836_v58, %v892_v59 }
  0x6f   : > { %v1042_v55 = vsub.f32 %v841_v61, %v892_v59  ;;  %v1049_v58 = vsub.f32 %v846_v4, %v892_v59  ;;  %v1056_v61 = vsub.f32 %v851_v8, %v892_v59  ;;  %v1063_v4 = vsub.f32 %v856_v12, %v892_v59 }
  0x70   : > { %v330_v54 = vadd.f32 %v329_v48, %v328_v50  ;;  %v303_v48 = vmul.f32 %v1021_v46, %v1021_v46  ;;  %v349_v50 = vsel %vm180_vm0, %v301_v38, 0.0  ;;  %v1070_v8 = vsub.f32 %v861_v17, %v892_v59 }
  0x71   : > { %v1077_v12 = vsub.f32 %v866_v21, %v892_v59  ;;  %v1084_v17 = vsub.f32 %v871_v26, %v892_v59  ;;  %v1091_v21 = vsub.f32 %v876_v30, %v892_v59  ;;  %v1098_v26 = vsub.f32 %v881_v35, %v892_v59 }
  0x72   : > { %v332_v0 = vadd.f32 %v331_v53, %v330_v54  ;;  %v304_v53 = vmul.f32 %v1028_v49, %v1028_v49  ;;  %v351_v54 = vsel %vm180_vm0, %v302_v44, 0.0  ;;  %v1105_v30 = vsub.f32 %v886_v39, %v892_v59 }
  0x73   : > { %v314_v35 = vmul.f32 %v1098_v26, %v1098_v26 }
  0x74   : > { %v334_v3 = vadd.f32 %v333_v57, %v332_v0  ;;  %v305_v57 = vmul.f32 %v1035_v52, %v1035_v52  ;;  %v353_v0 = vsel %vm180_vm0, %v303_v48, 0.0 }
  0x75   : > { %v375_v39 = vsel %vm180_vm0, %v314_v35, 0.0 }
  0x76   : > { %v336_v15 = vadd.f32 %v335_v1, %v334_v3  ;;  %v306_v1 = vmul.f32 %v1042_v55, %v1042_v55  ;;  %v355_v3 = vsel %vm180_vm0, %v304_v53, 0.0 }
  0x78   : > { %v338_v23 = vadd.f32 %v337_v14, %v336_v15  ;;  %v307_v14 = vmul.f32 %v1049_v58, %v1049_v58  ;;  %v357_v15 = vsel %vm180_vm0, %v305_v57, 0.0  ;;  %v315_v57 = vmul.f32 %v1105_v30, %v1105_v30 }
  0x7a   : > { %v340_v29 = vadd.f32 %v339_v20, %v338_v23  ;;  %v308_v20 = vmul.f32 %v1056_v61, %v1056_v61  ;;  %v359_v23 = vsel %vm180_vm0, %v306_v1, 0.0  ;;  %v377_v1 = vsel %vm180_vm0, %v315_v57, 0.0 }
  0x7c   : > { %v342_v36 = vadd.f32 %v341_v24, %v340_v29  ;;  %v309_v24 = vmul.f32 %v1063_v4, %v1063_v4  ;;  %v361_v29 = vsel %vm180_vm0, %v307_v14, 0.0 }
  0x7e   : > { %v344_v42 = vadd.f32 %v343_v33, %v342_v36  ;;  %v310_v33 = vmul.f32 %v1070_v8, %v1070_v8  ;;  %v363_v36 = vsel %vm180_vm0, %v308_v20, 0.0 }
  0x80   : > { %v346_v47 = vadd.f32 %v345_v41, %v344_v42  ;;  %v311_v41 = vmul.f32 %v1077_v12, %v1077_v12  ;;  %v365_v42 = vsel %vm180_vm0, %v309_v24, 0.0 }
  0x82   : > { %v348_v51 = vadd.f32 %v347_v45, %v346_v47  ;;  %v312_v45 = vmul.f32 %v1084_v17, %v1084_v17  ;;  %v367_v47 = vsel %vm180_vm0, %v310_v33, 0.0 }
  0x84   : > { %v350_v56 = vadd.f32 %v349_v50, %v348_v51  ;;  %v313_v50 = vmul.f32 %v1091_v21, %v1091_v21  ;;  %v369_v51 = vsel %vm180_vm0, %v311_v41, 0.0 }
  0x86   : > { %v352_v9 = vadd.f32 %v351_v54, %v350_v56  ;;  %v371_v54 = vsel %vm180_vm0, %v312_v45, 0.0 }
  0x88   : > { %v354_v11 = vadd.f32 %v353_v0, %v352_v9  ;;  %v373_v0 = vsel %vm180_vm0, %v313_v50, 0.0 }
  0x8a   : > { %v356_v18 = vadd.f32 %v355_v3, %v354_v11 }
  0x8c   : > { %v358_v13 = vadd.f32 %v357_v15, %v356_v18 }
  0x8e   : > { %v360_v32 = vadd.f32 %v359_v23, %v358_v13 }
  0x90   : > { %v362_v38 = vadd.f32 %v361_v29, %v360_v32 }
  0x92   : > { %v364_v44 = vadd.f32 %v363_v36, %v362_v38 }
  0x94   : > { %v366_v48 = vadd.f32 %v365_v42, %v364_v44 }
  0x96   : > { %v368_v53 = vadd.f32 %v367_v47, %v366_v48 }
  0x98   : > { %v370_v56 = vadd.f32 %v369_v51, %v368_v53 }
  0x9a   : > { %v372_v9 = vadd.f32 %v371_v54, %v370_v56 }
  0x9c   : > { %v374_v59 = vadd.f32 %v373_v0, %v372_v9 }
  0x9e   : > { %v376_v3 = vadd.f32 %v375_v39, %v374_v59 }
  0xa0   : > { %v378_v11 = vadd.f32 %v377_v1, %v376_v3 }
  0xa2   : > { %v379_v14 = vrot.slane %v378_v11, 4 }
  0xa4   : > { %v380_v15 = vadd.f32 %v379_v14, %v378_v11 }
  0xa6   : > { %v381_v18 = vrot.slane %v380_v15, 2 }
  0xa8   : > { %v382_v20 = vadd.f32 %v381_v18, %v380_v15 }
  0xaa   : > { %v383_v23 = vrot.slane %v382_v20, 1 }
  0xac   : > { %v384_v13 = vadd.f32 %v383_v23, %v382_v20 }
  0xae   : > { %v385_v24 = vmul.f32 0.00390625, %v384_v13 }
  0xb0   : > { %v386_v29 = vadd.f32 1e-05, %v385_v24 }
  0xb2   : > { %668 = vrsqrt.f32 %v386_v29 }
  0xbc   : > { %v1118_v32 = vpop.eup %668 }
  0xbd   : > { %v388_v33 = vmul.f32 %v1118_v32, %v896_v60  ;;  %v389_v36 = vmul.f32 %v1118_v32, %v900_v62  ;;  %v390_v38 = vmul.f32 %v1118_v32, %v904_v63  ;;  %v391_v41 = vmul.f32 %v1118_v32, %v908_v5 }
  0xbe   : > { %v392_v42 = vmul.f32 %v1118_v32, %v912_v6  ;;  %v393_v44 = vmul.f32 %v1118_v32, %v922_v2  ;;  %v394_v45 = vmul.f32 %v1118_v32, %v928_v7  ;;  %v395_v60 = vmul.f32 %v1118_v32, %v937_v10 }
  0xbf   : > { %vm420_vm1 = vcmp.gt.f32.partialorder %v388_v33, 0.0  ;;  %v452_v62 = vmul.f32 0.2, %v388_v33  ;;  %vm421_vm2 = vcmp.gt.f32.partialorder %v389_v36, 0.0  ;;  %v453_v63 = vmul.f32 0.2, %v389_v36 }
  0xc0   : > { %vm422_vm3 = vcmp.gt.f32.partialorder %v390_v38, 0.0  ;;  %v454_v5 = vmul.f32 0.2, %v390_v38  ;;  %vm423_vm4 = vcmp.gt.f32.partialorder %v391_v41, 0.0  ;;  %v455_v6 = vmul.f32 0.2, %v391_v41 }
  0xc1   : > { %v484_v2 = vsel %vm420_vm1, %v388_v33, %v452_v62  ;;  %v485_v7 = vsel %vm421_vm2, %v389_v36, %v453_v63  ;;  %vm424_vm5 = vcmp.gt.f32.partialorder %v392_v42, 0.0  ;;  %v456_v10 = vmul.f32 0.2, %v392_v42 }
  0xc2   : > { %516 = vst.msk [vmem:[%s1141_s16] sm:$0xff] %vm180_vm0, %v484_v2  ;;  %517 = vst.msk [vmem:[%s1141_s16 + $0x8] sm:$0xff] %vm180_vm0, %v485_v7  ;;  %v486_v47 = vsel %vm422_vm3, %v390_v38, %v454_v5  ;;  %v487_v48 = vsel %vm423_vm4, %v391_v41, %v455_v6  ;;  %vm425_vm6 = vcmp.gt.f32.partialorder %v393_v44, 0.0  ;;  %v457_v50 = vmul.f32 0.2, %v393_v44 }
  0xc3   : > { %518 = vst.msk [vmem:[%s1141_s16 + $0x10] sm:$0xff] %vm180_vm0, %v486_v47  ;;  %519 = vst.msk [vmem:[%s1141_s16 + $0x18] sm:$0xff] %vm180_vm0, %v487_v48  ;;  %v488_v51 = vsel %vm424_vm5, %v392_v42, %v456_v10  ;;  %vm426_vm7 = vcmp.gt.f32.partialorder %v394_v45, 0.0  ;;  %v458_v53 = vmul.f32 0.2, %v394_v45  ;;  %vm427_vm8 = vcmp.gt.f32.partialorder %v395_v60, 0.0 }
  0xc4   : > { %520 = vst.msk [vmem:[%s1141_s16 + $0x20] sm:$0xff] %vm180_vm0, %v488_v51  ;;  %v489_v35 = vsel %vm425_vm6, %v393_v44, %v457_v50  ;;  %v459_v54 = vmul.f32 0.2, %v395_v60  ;;  %v396_v56 = vmul.f32 %v1118_v32, %v944_v27  ;;  %v397_v57 = vmul.f32 %v1118_v32, %v951_v16 }
  0xc5   : > { %521 = vst.msk [vmem:[%s1141_s16 + $0x28] sm:$0xff] %vm180_vm0, %v489_v35  ;;  %v490_v0 = vsel %vm426_vm7, %v394_v45, %v458_v53  ;;  %v398_v9 = vmul.f32 %v1118_v32, %v958_v19  ;;  %v399_v39 = vmul.f32 %v1118_v32, %v965_v22  ;;  %v400_v59 = vmul.f32 %v1118_v32, %v972_v25 }
  0xc6   : > { %522 = vst.msk [vmem:[%s1141_s16 + $0x30] sm:$0xff] %vm180_vm0, %v490_v0  ;;  %v491_v1 = vsel %vm427_vm8, %v395_v60, %v459_v54  ;;  %vm428_vm9 = vcmp.gt.f32.partialorder %v396_v56, 0.0  ;;  %v460_v27 = vmul.f32 0.2, %v396_v56  ;;  %vm429_vm10 = vcmp.gt.f32.partialorder %v397_v57, 0.0 }
  0xc7   : > { %523 = vst.msk [vmem:[%s1141_s16 + $0x38] sm:$0xff] %vm180_vm0, %v491_v1  ;;  %v461_v16 = vmul.f32 0.2, %v397_v57  ;;  %vm430_vm11 = vcmp.gt.f32.partialorder %v398_v9, 0.0  ;;  %v462_v19 = vmul.f32 0.2, %v398_v9  ;;  %v401_v15 = vmul.f32 %v1118_v32, %v979_v28 }
  0xc8   : > { %vm431_vm12 = vcmp.gt.f32.partialorder %v399_v39, 0.0  ;;  %v492_v22 = vsel %vm428_vm9, %v396_v56, %v460_v27  ;;  %v463_v3 = vmul.f32 0.2, %v399_v39  ;;  %vm432_vm13 = vcmp.gt.f32.partialorder %v400_v59, 0.0 }
  0xc9   : > { %v464_v25 = vmul.f32 0.2, %v400_v59  ;;  %524 = vst.msk [vmem:[%s1141_s16 + $0x40] sm:$0xff] %vm180_vm0, %v492_v22  ;;  %v493_v11 = vsel %vm429_vm10, %v397_v57, %v461_v16  ;;  %v494_v14 = vsel %vm430_vm11, %v398_v9, %v462_v19  ;;  %v402_v18 = vmul.f32 %v1118_v32, %v986_v31 }
  0xca   : > { %525 = vst.msk [vmem:[%s1141_s16 + $0x48] sm:$0xff] %vm180_vm0, %v493_v11  ;;  %526 = vst.msk [vmem:[%s1141_s16 + $0x50] sm:$0xff] %vm180_vm0, %v494_v14  ;;  %v495_v20 = vsel %vm431_vm12, %v399_v39, %v463_v3  ;;  %v403_v13 = vmul.f32 %v1118_v32, %v993_v34  ;;  %v404_v24 = vmul.f32 %v1118_v32, %v1000_v37  ;;  %vm433_vm14 = vcmp.gt.f32.partialorder %v401_v15, 0.0 }
  0xcb   : > { %v496_v23 = vsel %vm432_vm13, %v400_v59, %v464_v25  ;;  %527 = vst.msk [vmem:[%s1141_s16 + $0x58] sm:$0xff] %vm180_vm0, %v495_v20  ;;  %v465_v28 = vmul.f32 0.2, %v401_v15  ;;  %vm434_vm15 = vcmp.gt.f32.partialorder %v402_v18, 0.0  ;;  %v466_v31 = vmul.f32 0.2, %v402_v18 }
  0xcc   : > { %528 = vst.msk [vmem:[%s1141_s16 + $0x60] sm:$0xff] %vm180_vm0, %v496_v23  ;;  %vm435_vm1 = vcmp.gt.f32.partialorder %v403_v13, 0.0  ;;  %v467_v29 = vmul.f32 0.2, %v403_v13  ;;  %vm436_vm2 = vcmp.gt.f32.partialorder %v404_v24, 0.0  ;;  %v405_v37 = vmul.f32 %v1118_v32, %v1007_v40 }
  0xcd   : > { %v468_v33 = vmul.f32 0.2, %v404_v24  ;;  %v497_v34 = vsel %vm433_vm14, %v401_v15, %v465_v28  ;;  %v498_v36 = vsel %vm434_vm15, %v402_v18, %v466_v31  ;;  %v406_v38 = vmul.f32 %v1118_v32, %v1014_v43 }
  0xce   : > { %529 = vst.msk [vmem:[%s1141_s16 + $0x68] sm:$0xff] %vm180_vm0, %v497_v34  ;;  %530 = vst.msk [vmem:[%s1141_s16 + $0x70] sm:$0xff] %vm180_vm0, %v498_v36  ;;  %v499_v41 = vsel %vm435_vm1, %v403_v13, %v467_v29  ;;  %v407_v44 = vmul.f32 %v1118_v32, %v1021_v46  ;;  %v408_v45 = vmul.f32 %v1118_v32, %v1028_v49  ;;  %vm437_vm3 = vcmp.gt.f32.partialorder %v405_v37, 0.0 }
  0xcf   : > { %v500_v42 = vsel %vm436_vm2, %v404_v24, %v468_v33  ;;  %531 = vst.msk [vmem:[%s1141_s16 + $0x78] sm:$0xff] %vm180_vm0, %v499_v41  ;;  %v469_v40 = vmul.f32 0.2, %v405_v37  ;;  %vm438_vm4 = vcmp.gt.f32.partialorder %v406_v38, 0.0  ;;  %v470_v43 = vmul.f32 0.2, %v406_v38 }
  0xd0   : > { %532 = vst.msk [vmem:[%s1141_s16 + $0x80] sm:$0xff] %vm180_vm0, %v500_v42  ;;  %vm439_vm5 = vcmp.gt.f32.partialorder %v407_v44, 0.0  ;;  %v471_v60 = vmul.f32 0.2, %v407_v44  ;;  %vm440_vm6 = vcmp.gt.f32.partialorder %v408_v45, 0.0  ;;  %v409_v49 = vmul.f32 %v1118_v32, %v1035_v52 }
  0xd1   : > { %v472_v62 = vmul.f32 0.2, %v408_v45  ;;  %v501_v46 = vsel %vm437_vm3, %v405_v37, %v469_v40  ;;  %v502_v63 = vsel %vm438_vm4, %v406_v38, %v470_v43  ;;  %v410_v5 = vmul.f32 %v1118_v32, %v1042_v55 }
  0xd2   : > { %533 = vst.msk [vmem:[%s1141_s16 + $0x88] sm:$0xff] %vm180_vm0, %v501_v46  ;;  %534 = vst.msk [vmem:[%s1141_s16 + $0x90] sm:$0xff] %vm180_vm0, %v502_v63  ;;  %v503_v6 = vsel %vm439_vm5, %v407_v44, %v471_v60  ;;  %v411_v7 = vmul.f32 %v1118_v32, %v1049_v58  ;;  %v412_v10 = vmul.f32 %v1118_v32, %v1056_v61  ;;  %vm441_vm7 = vcmp.gt.f32.partialorder %v409_v49, 0.0 }
  0xd3   : > { %v504_v2 = vsel %vm440_vm6, %v408_v45, %v472_v62  ;;  %535 = vst.msk [vmem:[%s1141_s16 + $0x98] sm:$0xff] %vm180_vm0, %v503_v6  ;;  %v473_v52 = vmul.f32 0.2, %v409_v49  ;;  %vm442_vm8 = vcmp.gt.f32.partialorder %v410_v5, 0.0  ;;  %v474_v55 = vmul.f32 0.2, %v410_v5 }
  0xd4   : > { %536 = vst.msk [vmem:[%s1141_s16 + $0xa0] sm:$0xff] %vm180_vm0, %v504_v2  ;;  %vm443_vm9 = vcmp.gt.f32.partialorder %v411_v7, 0.0  ;;  %v475_v47 = vmul.f32 0.2, %v411_v7  ;;  %vm444_vm10 = vcmp.gt.f32.partialorder %v412_v10, 0.0  ;;  %v413_v61 = vmul.f32 %v1118_v32, %v1063_v4 }
  0xd5   : > { %v476_v48 = vmul.f32 0.2, %v412_v10  ;;  %v505_v58 = vsel %vm441_vm7, %v409_v49, %v473_v52  ;;  %v506_v50 = vsel %vm442_vm8, %v410_v5, %v474_v55  ;;  %v414_v51 = vmul.f32 %v1118_v32, %v1070_v8 }
  0xd6   : > { %537 = vst.msk [vmem:[%s1141_s16 + $0xa8] sm:$0xff] %vm180_vm0, %v505_v58  ;;  %538 = vst.msk [vmem:[%s1141_s16 + $0xb0] sm:$0xff] %vm180_vm0, %v506_v50  ;;  %v507_v53 = vsel %vm443_vm9, %v411_v7, %v475_v47  ;;  %v415_v54 = vmul.f32 %v1118_v32, %v1077_v12  ;;  %v416_v56 = vmul.f32 %v1118_v32, %v1084_v17  ;;  %vm445_vm11 = vcmp.gt.f32.partialorder %v413_v61, 0.0 }
  0xd7   : > { %v508_v35 = vsel %vm444_vm10, %v412_v10, %v476_v48  ;;  %539 = vst.msk [vmem:[%s1141_s16 + $0xb8] sm:$0xff] %vm180_vm0, %v507_v53  ;;  %v477_v4 = vmul.f32 0.2, %v413_v61  ;;  %vm446_vm12 = vcmp.gt.f32.partialorder %v414_v51, 0.0  ;;  %v478_v8 = vmul.f32 0.2, %v414_v51 }
  0xd8   : > { %540 = vst.msk [vmem:[%s1141_s16 + $0xc0] sm:$0xff] %vm180_vm0, %v508_v35  ;;  %vm447_vm13 = vcmp.gt.f32.partialorder %v415_v54, 0.0  ;;  %v479_v57 = vmul.f32 0.2, %v415_v54  ;;  %vm448_vm14 = vcmp.gt.f32.partialorder %v416_v56, 0.0  ;;  %v417_v17 = vmul.f32 %v1118_v32, %v1091_v21 }
  0xd9   : > { %v480_v0 = vmul.f32 0.2, %v416_v56  ;;  %v509_v12 = vsel %vm445_vm11, %v413_v61, %v477_v4  ;;  %v510_v9 = vsel %vm446_vm12, %v414_v51, %v478_v8  ;;  %v418_v39 = vmul.f32 %v1118_v32, %v1098_v26 }
  0xda   : > { %541 = vst.msk [vmem:[%s1141_s16 + $0xc8] sm:$0xff] %vm180_vm0, %v509_v12  ;;  %542 = vst.msk [vmem:[%s1141_s16 + $0xd0] sm:$0xff] %vm180_vm0, %v510_v9  ;;  %v511_v59 = vsel %vm447_vm13, %v415_v54, %v479_v57  ;;  %v419_v27 = vmul.f32 %v1118_v32, %v1105_v30  ;;  %vm449_vm15 = vcmp.gt.f32.partialorder %v417_v17, 0.0  ;;  %v481_v21 = vmul.f32 0.2, %v417_v17 }
  0xdb   : > { %v512_v1 = vsel %vm448_vm14, %v416_v56, %v480_v0  ;;  %543 = vst.msk [vmem:[%s1141_s16 + $0xd8] sm:$0xff] %vm180_vm0, %v511_v59  ;;  %vm450_vm1 = vcmp.gt.f32.partialorder %v418_v39, 0.0  ;;  %v482_v26 = vmul.f32 0.2, %v418_v39 }
  0xdc   : > { %544 = vst.msk [vmem:[%s1141_s16 + $0xe0] sm:$0xff] %vm180_vm0, %v512_v1  ;;  %vm451_vm2 = vcmp.gt.f32.partialorder %v419_v27, 0.0  ;;  %v483_v16 = vmul.f32 0.2, %v419_v27  ;;  %v513_v19 = vsel %vm449_vm15, %v417_v17, %v481_v21 }
  0xdd   : > { %v514_v22 = vsel %vm450_vm1, %v418_v39, %v482_v26  ;;  %545 = vst.msk [vmem:[%s1141_s16 + $0xe8] sm:$0xff] %vm180_vm0, %v513_v19 }
  0xde   : > { %546 = vst.msk [vmem:[%s1141_s16 + $0xf0] sm:$0xff] %vm180_vm0, %v514_v22  ;;  %v515_v3 = vsel %vm451_vm2, %v419_v27, %v483_v16 }
  0xdf   : > { %547 = vst.msk [vmem:[%s1141_s16 + $0xf8] sm:$0xff] %vm180_vm0, %v515_v3 }
  0xe0 PF: > { %s11_s8 = sadd.s32 1, %s692_s8   ;;  %s1266_s6 = smov %s688_s7 }
  0xe1   : > { %p8_p5 = scmp.ge.s32.totalorder %s11_s8, 4   ;;  %s1267_s7 = smov %s1269_s9 }
  0xe3   :  { %10 = sbr.rel (!%p8_p5) target bundleno = 2 (0x2), region = 54 }

// kernel: encoder_forward.22
= control target key start
LH: loop header
LB: loop body
LE: loop exit
PB: predicated region body
PF: predicated region fallthrough
CT: control target
= control target key end

     0   :  { %s1425_s12 = smov 0   ;;  %s1427_s13 = smov 0   ;;  %s1618_s0 = inlined_call_operand.vmem [shape: bf16[512,256], index: 0, kind: input, shape index: {}]   ;;  %s1619_s1 = inlined_call_operand.vmem [shape: bf16[256,128], index: 1, kind: input, shape index: {}]   ;;  %s1620_s2 = inlined_call_operand.vmem [shape: f32[1,128], index: 2, kind: input, shape index: {}]   ;;  %s1621_s3 = inlined_call_operand.vmem [shape: f32[512,128], index: 3, kind: output, shape index: {}]  }
   0x1   :  { %s1429_s14 = smov 0  }
   0x2 LB: > { %s32_s15 = sadd.s32 1, %s1399_s13  ;;  %p1107_p0 = scmp.ge.s32.totalorder %s1403_s14, 1  ;;  %s1403_s14 = sphi %s1429_s14, %s13_s14   ;;  %s1399_s13 = sphi %s1427_s13, %s1623_s13   ;;  %s1395_s12 = sphi %s1425_s12, %s1622_s12  }
   0x3   : > { %p34_p1 = scmp.ge.s32.totalorder %s32_s15, 2  ;;  %p191_p2 = scmp.lt.s32.totalorder %s1403_s14, 3 }
   0x5   : > { %s1625_s15 = smov (%p34_p1, %s32_s15), 0  ;;  %p192_p3 = pnand %p1107_p0, %p191_p2 }
   0x6   : > { %v1317_v0 = vld [vmem:[%s1619_s1 + $0x40] sm:$0xff] (!%p192_p3)   ;;  %s1108_s18 = sshll.u32 (!%p192_p3), %s1395_s12, 5  ;;  %v1319_v2 = vld [vmem:[%s1619_s1 + $0x48] sm:$0xff] (!%p192_p3)   ;;  %v1321_v4 = vld [vmem:[%s1619_s1 + $0x50] sm:$0xff] (!%p192_p3)  }
   0x7   : > { %195 = sbr.rel (%p192_p3) target bundleno = 315 (0x13b), region = 32  ;;  %v1318_v1 = vld [vmem:[%s1619_s1] sm:$0xff] (!%p192_p3)   ;;  %1165 = vmatprep.subr.bf16.mxu0 (!%p192_p3), %v1317_v0  ;;  %1277 = vmatprep.subr.bf16.mxu1 (!%p192_p3), %v1317_v0  ;;  %v1320_v3 = vld [vmem:[%s1619_s1 + $0x8] sm:$0xff] (!%p192_p3)   ;;  %p236_p4 = scmp.lt.s32.totalorder (!%p192_p3), %s1108_s18, 63  ;;  %v1322_v5 = vld [vmem:[%s1619_s1 + $0x10] sm:$0xff] (!%p192_p3)  }
   0x8   : > { %1166 = vmatpush3.bf16.msra.mxu0 (!%p192_p3), %v1318_v1  ;;  %1285 = vmatpush3.bf16.msra.mxu1 (!%p192_p3), %v1318_v1  ;;  %v1323_v6 = vld [vmem:[%s1619_s1 + $0x58] sm:$0xff] (!%p192_p3)   ;;  %v1325_v8 = vld [vmem:[%s1619_s1 + $0x60] sm:$0xff] (!%p192_p3)   ;;  %v1327_v10 = vld [vmem:[%s1619_s1 + $0x68] sm:$0xff] (!%p192_p3)  }
   0x9   : > { %1167 = vmatprep.subr.bf16.mxu0 (!%p192_p3), %v1319_v2  ;;  %1278 = vmatprep.subr.bf16.mxu1 (!%p192_p3), %v1319_v2  ;;  %v1324_v7 = vld [vmem:[%s1619_s1 + $0x18] sm:$0xff] (!%p192_p3)   ;;  %v1326_v9 = vld [vmem:[%s1619_s1 + $0x20] sm:$0xff] (!%p192_p3)   ;;  %v1328_v13 = vld [vmem:[%s1619_s1 + $0x28] sm:$0xff] (!%p192_p3)  }
   0xa   : > { %v1329_v14 = vld [vmem:[%s1619_s1 + $0x70] sm:$0xff] (!%p192_p3)   ;;  %v1331_v16 = vld [vmem:[%s1619_s1 + $0x78] sm:$0xff] (!%p192_p3)   ;;  %v1536_v51 = vld [vmem:[%s1620_s2] ss:$0 sm:$0xff] (!%p192_p3) }
   0xb   : > { %v1330_v15 = vld [vmem:[%s1619_s1 + $0x30] sm:$0xff] (!%p192_p3)   ;;  %v1332_v17 = vld [vmem:[%s1619_s1 + $0x38] sm:$0xff] (!%p192_p3)  }
   0xc   : > { %1168 = vmatpush3.bf16.msra.mxu0 (!%p192_p3), %v1320_v3  ;;  %1286 = vmatpush3.bf16.msra.mxu1 (!%p192_p3), %v1320_v3 }
   0xd   : > { %1169 = vmatprep.subr.bf16.mxu0 (!%p192_p3), %v1321_v4  ;;  %1279 = vmatprep.subr.bf16.mxu1 (!%p192_p3), %v1321_v4 }
   0xe   : > { %s1627_s18 = smov (!%p236_p4, %s1108_s18), 63 }
   0xf   : > { %s1164_s6 = sshll.u32 %s1627_s18, 3 }
  0x10   : > { %1170 = vmatpush3.bf16.msra.mxu0 %v1322_v5  ;;  %1287 = vmatpush3.bf16.msra.mxu1 %v1322_v5  ;;  %s1478_s11 = scalar_lea.vmem %s1618_s0, %s1164_s6  ;;  %s1543_s8 = scalar_lea.vmem %s1621_s3, %s1164_s6 }
  0x11   : > { %1171 = vmatprep.subr.bf16.mxu0 %v1323_v6  ;;  %1280 = vmatprep.subr.bf16.mxu1 %v1323_v6  ;;  %v1335_v11 = vld [vmem:[%s1478_s11 + $0x4] ss:$8 sps:$4 sm:$0xff]   ;;  %v1333_v18 = vld [vmem:[%s1478_s11] ss:$8 sps:$4 sm:$0xff]   ;;  %v1339_v20 = vld [vmem:[%s1478_s11 + $0x14] ss:$8 sps:$4 sm:$0xff]  }
  0x12   : > { %v1338_v12 = vld [vmem:[%s1478_s11 + $0x84] ss:$8 sps:$4 sm:$0xff]   ;;  %688 = vmatprep.mubr.bf16.mxu0 %v1335_v11  ;;  %v1336_v19 = vld [vmem:[%s1478_s11 + $0x80] ss:$8 sps:$4 sm:$0xff]   ;;  %v1341_v21 = vld [vmem:[%s1478_s11 + $0x94] ss:$8 sps:$4 sm:$0xff]  }
  0x13   : > { %752 = vmatprep.mubr.bf16.mxu1 %v1338_v12  ;;  %v1343_v22 = vld [vmem:[%s1478_s11 + $0x10] ss:$8 sps:$4 sm:$0xff]   ;;  %v1345_v24 = vld [vmem:[%s1478_s11 + $0x24] ss:$8 sps:$4 sm:$0xff]   ;;  %v1349_v26 = vld [vmem:[%s1478_s11 + $0x20] ss:$8 sps:$4 sm:$0xff]  }
  0x14   : > { %1172 = vmatpush3.bf16.msra.mxu0 %v1324_v7  ;;  %1288 = vmatpush3.bf16.msra.mxu1 %v1324_v7  ;;  %v1344_v23 = vld [vmem:[%s1478_s11 + $0x90] ss:$8 sps:$4 sm:$0xff]   ;;  %v1347_v25 = vld [vmem:[%s1478_s11 + $0xa4] ss:$8 sps:$4 sm:$0xff]   ;;  %v1350_v27 = vld [vmem:[%s1478_s11 + $0xa0] ss:$8 sps:$4 sm:$0xff]  }
  0x15   : > { %1173 = vmatprep.subr.bf16.mxu0 %v1325_v8  ;;  %1281 = vmatprep.subr.bf16.mxu1 %v1325_v8  ;;  %v1351_v28 = vld [vmem:[%s1478_s11 + $0x34] ss:$8 sps:$4 sm:$0xff]   ;;  %v1355_v30 = vld [vmem:[%s1478_s11 + $0x30] ss:$8 sps:$4 sm:$0xff]   ;;  %v1357_v32 = vld [vmem:[%s1478_s11 + $0x44] ss:$8 sps:$4 sm:$0xff]  }
  0x16   : > { %v1353_v29 = vld [vmem:[%s1478_s11 + $0xb4] ss:$8 sps:$4 sm:$0xff]   ;;  %v1356_v31 = vld [vmem:[%s1478_s11 + $0xb0] ss:$8 sps:$4 sm:$0xff]   ;;  %v1359_v33 = vld [vmem:[%s1478_s11 + $0xc4] ss:$8 sps:$4 sm:$0xff]  }
  0x17   : > { %v1361_v34 = vld [vmem:[%s1478_s11 + $0x40] ss:$8 sps:$4 sm:$0xff]   ;;  %v1363_v36 = vld [vmem:[%s1478_s11 + $0x54] ss:$8 sps:$4 sm:$0xff]   ;;  %v1367_v38 = vld [vmem:[%s1478_s11 + $0x50] ss:$8 sps:$4 sm:$0xff]  }
  0x18   : > { %1174 = vmatpush3.bf16.msra.mxu0 %v1326_v9  ;;  %1289 = vmatpush3.bf16.msra.mxu1 %v1326_v9  ;;  %v1362_v35 = vld [vmem:[%s1478_s11 + $0xc0] ss:$8 sps:$4 sm:$0xff]   ;;  %v1365_v37 = vld [vmem:[%s1478_s11 + $0xd4] ss:$8 sps:$4 sm:$0xff]   ;;  %v1368_v39 = vld [vmem:[%s1478_s11 + $0xd0] ss:$8 sps:$4 sm:$0xff]  }
  0x19   : > { %1175 = vmatprep.subr.bf16.mxu0 %v1327_v10  ;;  %1282 = vmatprep.subr.bf16.mxu1 %v1327_v10  ;;  %v1369_v40 = vld [vmem:[%s1478_s11 + $0x64] ss:$8 sps:$4 sm:$0xff]   ;;  %v1373_v42 = vld [vmem:[%s1478_s11 + $0x60] ss:$8 sps:$4 sm:$0xff]   ;;  %v1375_v44 = vld [vmem:[%s1478_s11 + $0x74] ss:$8 sps:$4 sm:$0xff]  }
  0x1a   : > { %v1371_v41 = vld [vmem:[%s1478_s11 + $0xe4] ss:$8 sps:$4 sm:$0xff]   ;;  %v1374_v43 = vld [vmem:[%s1478_s11 + $0xe0] ss:$8 sps:$4 sm:$0xff]   ;;  %v1377_v45 = vld [vmem:[%s1478_s11 + $0xf4] ss:$8 sps:$4 sm:$0xff]  }
  0x1b   : > { %v1379_v46 = vld [vmem:[%s1478_s11 + $0x70] ss:$8 sps:$4 sm:$0xff]  }
  0x1c   : > { %1176 = vmatpush3.bf16.msra.mxu0 %v1328_v13  ;;  %1290 = vmatpush3.bf16.msra.mxu1 %v1328_v13  ;;  %v1380_v47 = vld [vmem:[%s1478_s11 + $0xf0] ss:$8 sps:$4 sm:$0xff]  }
  0x1d   : > { %1177 = vmatprep.subr.bf16.mxu0 %v1329_v14  ;;  %1283 = vmatprep.subr.bf16.mxu1 %v1329_v14 }
  0x20   : > { %1178 = vmatpush3.bf16.msra.mxu0 %v1330_v15  ;;  %1291 = vmatpush3.bf16.msra.mxu1 %v1330_v15 }
  0x21   : > { %1179 = vmatprep.subr.bf16.mxu0 %v1331_v16  ;;  %1284 = vmatprep.subr.bf16.mxu1 %v1331_v16 }
  0x24   : > { %1180 = vmatpush3.bf16.msra.mxu0 %v1332_v17  ;;  %1292 = vmatpush3.bf16.msra.mxu1 %v1332_v17 }
  0x27   : > { %689 = vmatmul.mubr.bf16.vlgmr.msra.gmra.mrb[0].mxu0 %v1333_v18  ;;  %753 = vmatmul.mubr.bf16.vlgmr.msra.gmra.mrb[0].mxu1 %v1336_v19 }
  0x28   : > { %696 = vmatprep.mubr.bf16.mxu0 %v1339_v20  ;;  %760 = vmatprep.mubr.bf16.mxu1 %v1341_v21 }
  0x2f   : > { %697 = vmatmul.mubr.bf16.gmra.mrb[4].mxu0 %v1343_v22  ;;  %761 = vmatmul.mubr.bf16.gmra.mrb[4].mxu1 %v1344_v23 }
  0x30   : > { %704 = vmatprep.mubr.bf16.mxu0 %v1345_v24  ;;  %768 = vmatprep.mubr.bf16.mxu1 %v1347_v25 }
  0x37   : > { %705 = vmatmul.mubr.bf16.gmra.mrb[8].mxu0 %v1349_v26  ;;  %769 = vmatmul.mubr.bf16.gmra.mrb[8].mxu1 %v1350_v27 }
  0x38   : > { %712 = vmatprep.mubr.bf16.mxu0 %v1351_v28  ;;  %776 = vmatprep.mubr.bf16.mxu1 %v1353_v29 }
  0x3f   : > { %713 = vmatmul.mubr.bf16.gmra.mrb[12].mxu0 %v1355_v30  ;;  %777 = vmatmul.mubr.bf16.gmra.mrb[12].mxu1 %v1356_v31 }
  0x40   : > { %720 = vmatprep.mubr.bf16.mxu0 %v1357_v32  ;;  %784 = vmatprep.mubr.bf16.mxu1 %v1359_v33 }
  0x47   : > { %721 = vmatmul.mubr.bf16.gmra.mrb[16].mxu0 %v1361_v34  ;;  %785 = vmatmul.mubr.bf16.gmra.mrb[16].mxu1 %v1362_v35 }
  0x48   : > { %728 = vmatprep.mubr.bf16.mxu0 %v1363_v36  ;;  %792 = vmatprep.mubr.bf16.mxu1 %v1365_v37 }
  0x4f   : > { %729 = vmatmul.mubr.bf16.gmra.mrb[20].mxu0 %v1367_v38  ;;  %793 = vmatmul.mubr.bf16.gmra.mrb[20].mxu1 %v1368_v39 }
  0x50   : > { %736 = vmatprep.mubr.bf16.mxu0 %v1369_v40  ;;  %800 = vmatprep.mubr.bf16.mxu1 %v1371_v41 }
  0x57   : > { %737 = vmatmul.mubr.bf16.gmra.mrb[24].mxu0 %v1373_v42  ;;  %801 = vmatmul.mubr.bf16.gmra.mrb[24].mxu1 %v1374_v43 }
  0x58   : > { %744 = vmatprep.mubr.bf16.mxu0 %v1375_v44  ;;  %808 = vmatprep.mubr.bf16.mxu1 %v1377_v45 }
  0x5f   : > { %745 = vmatmul.mubr.bf16.gmra.mrb[28].mxu0 %v1379_v46  ;;  %809 = vmatmul.mubr.bf16.gmra.mrb[28].mxu1 %v1380_v47 }
  0xfa   : > { %v1181_v48 = vpop.f32.mrb[0].mxu0  ;;  %v1229_v49 = vpop.f32.mrb[0].mxu1 }
  0xfb   : > { %v1182_v50 = vpop.f32.mrb[1].mxu0  ;;  %v1230_v52 = vpop.f32.mrb[1].mxu1 }
  0xfc   : > { %v1183_v53 = vadd.f32 %v1182_v50, %v1181_v48  ;;  %v1231_v54 = vadd.f32 %v1230_v52, %v1229_v49  ;;  %v1184_v55 = vpop.f32.mrb[2].mxu0  ;;  %v1232_v56 = vpop.f32.mrb[2].mxu1 }
  0xfd   : > { %v1185_v57 = vpop.f32.mrb[3].mxu0  ;;  %v1233_v58 = vpop.f32.mrb[3].mxu1 }
  0xfe   : > { %v923_v59 = vadd.f32 %v1183_v53, %v1536_v51  ;;  %v939_v60 = vadd.f32 %v1231_v54, %v1536_v51  ;;  %v1186_v61 = vadd.f32 %v1185_v57, %v1184_v55  ;;  %v1234_v62 = vadd.f32 %v1233_v58, %v1232_v56 }
 0x100   : > { %955 = vst [vmem:[%s1543_s8] sm:$0xff] %v923_v59  ;;  %971 = vst [vmem:[%s1543_s8 + $0x80] sm:$0xff] %v939_v60  ;;  %v924_v63 = vadd.f32 %v1186_v61, %v1536_v51  ;;  %v940_v0 = vadd.f32 %v1234_v62, %v1536_v51 }
 0x102   : > { %956 = vst [vmem:[%s1543_s8 + $0x8] sm:$0xff] %v924_v63  ;;  %972 = vst [vmem:[%s1543_s8 + $0x88] sm:$0xff] %v940_v0  ;;  %v1187_v1 = vpop.f32.mrb[4].mxu0  ;;  %v1235_v2 = vpop.f32.mrb[4].mxu1 }
 0x103   : > { %v1188_v3 = vpop.f32.mrb[5].mxu0  ;;  %v1236_v4 = vpop.f32.mrb[5].mxu1 }
 0x104   : > { %v1189_v5 = vadd.f32 %v1188_v3, %v1187_v1  ;;  %v1237_v6 = vadd.f32 %v1236_v4, %v1235_v2  ;;  %v1190_v7 = vpop.f32.mrb[6].mxu0  ;;  %v1238_v8 = vpop.f32.mrb[6].mxu1 }
 0x105   : > { %v1191_v9 = vpop.f32.mrb[7].mxu0  ;;  %v1239_v10 = vpop.f32.mrb[7].mxu1 }
 0x106   : > { %v925_v11 = vadd.f32 %v1189_v5, %v1536_v51  ;;  %v941_v12 = vadd.f32 %v1237_v6, %v1536_v51  ;;  %v1192_v13 = vadd.f32 %v1191_v9, %v1190_v7  ;;  %v1240_v14 = vadd.f32 %v1239_v10, %v1238_v8 }
 0x108   : > { %957 = vst [vmem:[%s1543_s8 + $0x10] sm:$0xff] %v925_v11  ;;  %973 = vst [vmem:[%s1543_s8 + $0x90] sm:$0xff] %v941_v12  ;;  %v926_v15 = vadd.f32 %v1192_v13, %v1536_v51  ;;  %v942_v16 = vadd.f32 %v1240_v14, %v1536_v51 }
 0x10a   : > { %958 = vst [vmem:[%s1543_s8 + $0x18] sm:$0xff] %v926_v15  ;;  %974 = vst [vmem:[%s1543_s8 + $0x98] sm:$0xff] %v942_v16  ;;  %v1193_v17 = vpop.f32.mrb[8].mxu0  ;;  %v1241_v18 = vpop.f32.mrb[8].mxu1 }
 0x10b   : > { %v1194_v19 = vpop.f32.mrb[9].mxu0  ;;  %v1242_v20 = vpop.f32.mrb[9].mxu1 }
 0x10c   : > { %v1195_v21 = vadd.f32 %v1194_v19, %v1193_v17  ;;  %v1243_v22 = vadd.f32 %v1242_v20, %v1241_v18  ;;  %v1196_v23 = vpop.f32.mrb[10].mxu0  ;;  %v1244_v24 = vpop.f32.mrb[10].mxu1 }
 0x10d   : > { %v1197_v25 = vpop.f32.mrb[11].mxu0  ;;  %v1245_v26 = vpop.f32.mrb[11].mxu1 }
 0x10e   : > { %v927_v27 = vadd.f32 %v1195_v21, %v1536_v51  ;;  %v943_v28 = vadd.f32 %v1243_v22, %v1536_v51  ;;  %v1198_v29 = vadd.f32 %v1197_v25, %v1196_v23  ;;  %v1246_v30 = vadd.f32 %v1245_v26, %v1244_v24 }
 0x110   : > { %959 = vst [vmem:[%s1543_s8 + $0x20] sm:$0xff] %v927_v27  ;;  %975 = vst [vmem:[%s1543_s8 + $0xa0] sm:$0xff] %v943_v28  ;;  %v928_v31 = vadd.f32 %v1198_v29, %v1536_v51  ;;  %v944_v32 = vadd.f32 %v1246_v30, %v1536_v51 }
 0x112   : > { %960 = vst [vmem:[%s1543_s8 + $0x28] sm:$0xff] %v928_v31  ;;  %976 = vst [vmem:[%s1543_s8 + $0xa8] sm:$0xff] %v944_v32  ;;  %v1199_v33 = vpop.f32.mrb[12].mxu0  ;;  %v1247_v34 = vpop.f32.mrb[12].mxu1 }
 0x113   : > { %v1200_v35 = vpop.f32.mrb[13].mxu0  ;;  %v1248_v36 = vpop.f32.mrb[13].mxu1 }
 0x114   : > { %v1201_v37 = vadd.f32 %v1200_v35, %v1199_v33  ;;  %v1249_v38 = vadd.f32 %v1248_v36, %v1247_v34  ;;  %v1202_v39 = vpop.f32.mrb[14].mxu0  ;;  %v1250_v40 = vpop.f32.mrb[14].mxu1 }
 0x115   : > { %v1203_v41 = vpop.f32.mrb[15].mxu0  ;;  %v1251_v42 = vpop.f32.mrb[15].mxu1 }
 0x116   : > { %v929_v43 = vadd.f32 %v1201_v37, %v1536_v51  ;;  %v945_v44 = vadd.f32 %v1249_v38, %v1536_v51  ;;  %v1204_v45 = vadd.f32 %v1203_v41, %v1202_v39  ;;  %v1252_v46 = vadd.f32 %v1251_v42, %v1250_v40 }
 0x118   : > { %961 = vst [vmem:[%s1543_s8 + $0x30] sm:$0xff] %v929_v43  ;;  %977 = vst [vmem:[%s1543_s8 + $0xb0] sm:$0xff] %v945_v44  ;;  %v930_v47 = vadd.f32 %v1204_v45, %v1536_v51  ;;  %v946_v48 = vadd.f32 %v1252_v46, %v1536_v51 }
 0x11a   : > { %962 = vst [vmem:[%s1543_s8 + $0x38] sm:$0xff] %v930_v47  ;;  %978 = vst [vmem:[%s1543_s8 + $0xb8] sm:$0xff] %v946_v48  ;;  %v1205_v49 = vpop.f32.mrb[16].mxu0  ;;  %v1253_v50 = vpop.f32.mrb[16].mxu1 }
 0x11b   : > { %v1206_v52 = vpop.f32.mrb[17].mxu0  ;;  %v1254_v53 = vpop.f32.mrb[17].mxu1 }
 0x11c   : > { %v1207_v54 = vadd.f32 %v1206_v52, %v1205_v49  ;;  %v1255_v55 = vadd.f32 %v1254_v53, %v1253_v50  ;;  %v1208_v56 = vpop.f32.mrb[18].mxu0  ;;  %v1256_v57 = vpop.f32.mrb[18].mxu1 }
 0x11d   : > { %v1209_v58 = vpop.f32.mrb[19].mxu0  ;;  %v1257_v59 = vpop.f32.mrb[19].mxu1 }
 0x11e   : > { %v931_v60 = vadd.f32 %v1207_v54, %v1536_v51  ;;  %v947_v61 = vadd.f32 %v1255_v55, %v1536_v51  ;;  %v1210_v62 = vadd.f32 %v1209_v58, %v1208_v56  ;;  %v1258_v63 = vadd.f32 %v1257_v59, %v1256_v57 }
 0x120   : > { %963 = vst [vmem:[%s1543_s8 + $0x40] sm:$0xff] %v931_v60  ;;  %979 = vst [vmem:[%s1543_s8 + $0xc0] sm:$0xff] %v947_v61  ;;  %v932_v0 = vadd.f32 %v1210_v62, %v1536_v51  ;;  %v948_v1 = vadd.f32 %v1258_v63, %v1536_v51 }
 0x122   : > { %964 = vst [vmem:[%s1543_s8 + $0x48] sm:$0xff] %v932_v0  ;;  %980 = vst [vmem:[%s1543_s8 + $0xc8] sm:$0xff] %v948_v1  ;;  %v1211_v2 = vpop.f32.mrb[20].mxu0  ;;  %v1259_v3 = vpop.f32.mrb[20].mxu1 }
 0x123   : > { %v1212_v4 = vpop.f32.mrb[21].mxu0  ;;  %v1260_v5 = vpop.f32.mrb[21].mxu1 }
 0x124   : > { %v1213_v6 = vadd.f32 %v1212_v4, %v1211_v2  ;;  %v1261_v7 = vadd.f32 %v1260_v5, %v1259_v3  ;;  %v1214_v8 = vpop.f32.mrb[22].mxu0  ;;  %v1262_v9 = vpop.f32.mrb[22].mxu1 }
 0x125   : > { %v1215_v10 = vpop.f32.mrb[23].mxu0  ;;  %v1263_v11 = vpop.f32.mrb[23].mxu1 }
 0x126   : > { %v933_v12 = vadd.f32 %v1213_v6, %v1536_v51  ;;  %v949_v13 = vadd.f32 %v1261_v7, %v1536_v51  ;;  %v1216_v14 = vadd.f32 %v1215_v10, %v1214_v8  ;;  %v1264_v15 = vadd.f32 %v1263_v11, %v1262_v9 }
 0x128   : > { %965 = vst [vmem:[%s1543_s8 + $0x50] sm:$0xff] %v933_v12  ;;  %981 = vst [vmem:[%s1543_s8 + $0xd0] sm:$0xff] %v949_v13  ;;  %v934_v16 = vadd.f32 %v1216_v14, %v1536_v51  ;;  %v950_v17 = vadd.f32 %v1264_v15, %v1536_v51 }
 0x12a   : > { %966 = vst [vmem:[%s1543_s8 + $0x58] sm:$0xff] %v934_v16  ;;  %982 = vst [vmem:[%s1543_s8 + $0xd8] sm:$0xff] %v950_v17  ;;  %v1217_v18 = vpop.f32.mrb[24].mxu0  ;;  %v1265_v19 = vpop.f32.mrb[24].mxu1 }
 0x12b   : > { %v1218_v20 = vpop.f32.mrb[25].mxu0  ;;  %v1266_v21 = vpop.f32.mrb[25].mxu1 }
 0x12c   : > { %v1219_v22 = vadd.f32 %v1218_v20, %v1217_v18  ;;  %v1267_v23 = vadd.f32 %v1266_v21, %v1265_v19  ;;  %v1220_v24 = vpop.f32.mrb[26].mxu0  ;;  %v1268_v25 = vpop.f32.mrb[26].mxu1 }
 0x12d   : > { %v1221_v26 = vpop.f32.mrb[27].mxu0  ;;  %v1269_v27 = vpop.f32.mrb[27].mxu1 }
 0x12e   : > { %v935_v28 = vadd.f32 %v1219_v22, %v1536_v51  ;;  %v951_v29 = vadd.f32 %v1267_v23, %v1536_v51  ;;  %v1222_v30 = vadd.f32 %v1221_v26, %v1220_v24  ;;  %v1270_v31 = vadd.f32 %v1269_v27, %v1268_v25 }
 0x130   : > { %967 = vst [vmem:[%s1543_s8 + $0x60] sm:$0xff] %v935_v28  ;;  %983 = vst [vmem:[%s1543_s8 + $0xe0] sm:$0xff] %v951_v29  ;;  %v936_v32 = vadd.f32 %v1222_v30, %v1536_v51  ;;  %v952_v33 = vadd.f32 %v1270_v31, %v1536_v51 }
 0x132   : > { %968 = vst [vmem:[%s1543_s8 + $0x68] sm:$0xff] %v936_v32  ;;  %984 = vst [vmem:[%s1543_s8 + $0xe8] sm:$0xff] %v952_v33  ;;  %v1223_v34 = vpop.f32.mrb[28].mxu0  ;;  %v1271_v35 = vpop.f32.mrb[28].mxu1 }
 0x133   : > { %v1224_v36 = vpop.f32.mrb[29].mxu0  ;;  %v1272_v37 = vpop.f32.mrb[29].mxu1 }
 0x134   : > { %v1225_v38 = vadd.f32 %v1224_v36, %v1223_v34  ;;  %v1273_v39 = vadd.f32 %v1272_v37, %v1271_v35  ;;  %v1226_v40 = vpop.f32.mrb[30].mxu0  ;;  %v1274_v41 = vpop.f32.mrb[30].mxu1 }
 0x135   : > { %v1227_v42 = vpop.f32.mrb[31].mxu0  ;;  %v1275_v43 = vpop.f32.mrb[31].mxu1 }
 0x136   : > { %v937_v44 = vadd.f32 %v1225_v38, %v1536_v51  ;;  %v953_v45 = vadd.f32 %v1273_v39, %v1536_v51  ;;  %v1228_v46 = vadd.f32 %v1227_v42, %v1226_v40  ;;  %v1276_v47 = vadd.f32 %v1275_v43, %v1274_v41 }
 0x138   : > { %969 = vst [vmem:[%s1543_s8 + $0x70] sm:$0xff] %v937_v44  ;;  %985 = vst [vmem:[%s1543_s8 + $0xf0] sm:$0xff] %v953_v45  ;;  %v938_v48 = vadd.f32 %v1228_v46, %v1536_v51  ;;  %v954_v49 = vadd.f32 %v1276_v47, %v1536_v51 }
 0x13a   : > { %970 = vst [vmem:[%s1543_s8 + $0x78] sm:$0xff] %v938_v48  ;;  %986 = vst [vmem:[%s1543_s8 + $0xf8] sm:$0xff] %v954_v49 }
 0x13b PF: > { %s13_s14 = sadd.s32 1, %s1403_s14   ;;  %s1622_s12 = smov %s1399_s13 }
 0x13c   : > { %p10_p5 = scmp.ge.s32.totalorder %s13_s14, 4   ;;  %s1623_s13 = smov %s1625_s15 }
 0x13e   :  { %12 = sbr.rel (!%p10_p5) target bundleno = 2 (0x2), region = 76 }

// kernel: encoder_forward.24
= control target key start
LH: loop header
LB: loop body
LE: loop exit
PB: predicated region body
PF: predicated region fallthrough
CT: control target
= control target key end

     0   :  { %s586_s1 = inlined_call_operand.vmem [shape: bf16[128,128], index: 1, kind: input, shape index: {}]   ;;  %s587_s0 = inlined_call_operand.vmem [shape: bf16[128,128], index: 0, kind: input, shape index: {}]   ;;  %s588_s2 = inlined_call_operand.vmem [shape: f32[1,128], index: 2, kind: input, shape index: {}]   ;;  %s589_s3 = inlined_call_operand.vmem [shape: f32[128,128], index: 3, kind: output, shape index: {}]  }
   0x1   :  { %v451_v0 = vld [vmem:[%s586_s1] sm:$0xff]   ;;  %v452_v1 = vld [vmem:[%s586_s1 + $0x8] sm:$0xff]   ;;  %v453_v2 = vld [vmem:[%s586_s1 + $0x10] sm:$0xff]  }
   0x2   :  { %403 = vmatprep.subr.bf16.mxu0 %v451_v0  ;;  %435 = vmatprep.subr.bf16.mxu1 %v451_v0  ;;  %v454_v3 = vld [vmem:[%s586_s1 + $0x18] sm:$0xff]   ;;  %v459_v4 = vld [vmem:[%s587_s0] sm:$0xff]   ;;  %v456_v7 = vld [vmem:[%s586_s1 + $0x28] sm:$0xff]  }
   0x3   :  { %404 = vmatpush3.bf16.msra.mxu0 %v451_v0  ;;  %443 = vmatpush3.bf16.msra.mxu1 %v451_v0  ;;  %v460_v5 = vld [vmem:[%s587_s0 + $0x20] sm:$0xff]   ;;  %v457_v8 = vld [vmem:[%s586_s1 + $0x30] sm:$0xff]   ;;  %v458_v9 = vld [vmem:[%s586_s1 + $0x38] sm:$0xff]  }
   0x4   :  { %405 = vmatprep.subr.bf16.mxu0 %v452_v1  ;;  %436 = vmatprep.subr.bf16.mxu1 %v452_v1  ;;  %v455_v6 = vld [vmem:[%s586_s1 + $0x20] sm:$0xff]   ;;  %v461_v10 = vld [vmem:[%s587_s0 + $0x8] sm:$0xff]   ;;  %v463_v12 = vld [vmem:[%s587_s0 + $0x10] sm:$0xff]  }
   0x5   :  { %419 = vmatprep.mubr.bf16.mxu0 %v459_v4  ;;  %427 = vmatprep.mubr.bf16.mxu1 %v460_v5  ;;  %v462_v11 = vld [vmem:[%s587_s0 + $0x28] sm:$0xff]   ;;  %v464_v13 = vld [vmem:[%s587_s0 + $0x30] sm:$0xff]   ;;  %v465_v14 = vld [vmem:[%s587_s0 + $0x18] sm:$0xff]  }
   0x6   :  { %v466_v15 = vld [vmem:[%s587_s0 + $0x38] sm:$0xff]   ;;  %v386_v16 = vld [vmem:[%s588_s2] ss:$0 sm:$0xff] }
   0x7   :  { %406 = vmatpush3.bf16.msra.mxu0 %v452_v1  ;;  %444 = vmatpush3.bf16.msra.mxu1 %v452_v1 }
   0x8   :  { %407 = vmatprep.subr.bf16.mxu0 %v453_v2  ;;  %437 = vmatprep.subr.bf16.mxu1 %v453_v2 }
   0xb   :  { %408 = vmatpush3.bf16.msra.mxu0 %v453_v2  ;;  %445 = vmatpush3.bf16.msra.mxu1 %v453_v2 }
   0xc   :  { %409 = vmatprep.subr.bf16.mxu0 %v454_v3  ;;  %438 = vmatprep.subr.bf16.mxu1 %v454_v3 }
   0xf   :  { %410 = vmatpush3.bf16.msra.mxu0 %v454_v3  ;;  %446 = vmatpush3.bf16.msra.mxu1 %v454_v3 }
  0x10   :  { %411 = vmatprep.subr.bf16.mxu0 %v455_v6  ;;  %439 = vmatprep.subr.bf16.mxu1 %v455_v6 }
  0x13   :  { %412 = vmatpush3.bf16.msra.mxu0 %v455_v6  ;;  %447 = vmatpush3.bf16.msra.mxu1 %v455_v6 }
  0x14   :  { %413 = vmatprep.subr.bf16.mxu0 %v456_v7  ;;  %440 = vmatprep.subr.bf16.mxu1 %v456_v7 }
  0x17   :  { %414 = vmatpush3.bf16.msra.mxu0 %v456_v7  ;;  %448 = vmatpush3.bf16.msra.mxu1 %v456_v7 }
  0x18   :  { %415 = vmatprep.subr.bf16.mxu0 %v457_v8  ;;  %441 = vmatprep.subr.bf16.mxu1 %v457_v8 }
  0x1b   :  { %416 = vmatpush3.bf16.msra.mxu0 %v457_v8  ;;  %449 = vmatpush3.bf16.msra.mxu1 %v457_v8 }
  0x1c   :  { %417 = vmatprep.subr.bf16.mxu0 %v458_v9  ;;  %442 = vmatprep.subr.bf16.mxu1 %v458_v9 }
  0x1f   :  { %418 = vmatpush3.bf16.msra.mxu0 %v458_v9  ;;  %450 = vmatpush3.bf16.msra.mxu1 %v458_v9 }
  0x22   :  { %420 = vmatmul.mubr.bf16.vlgmr.msra.gmra.mrb[0].mxu0 %v461_v10  ;;  %428 = vmatmul.mubr.bf16.vlgmr.msra.gmra.mrb[0].mxu1 %v462_v11 }
  0x23   :  { %423 = vmatprep.mubr.bf16.mxu0 %v463_v12  ;;  %431 = vmatprep.mubr.bf16.mxu1 %v464_v13 }
  0x2a   :  { %424 = vmatmul.mubr.bf16.gmra.mrb[4].mxu0 %v465_v14  ;;  %432 = vmatmul.mubr.bf16.gmra.mrb[4].mxu1 %v466_v15 }
  0xf5   :  { %v421_v17 = vpop.f32.mrb[0].mxu0  ;;  %v429_v18 = vpop.f32.mrb[0].mxu1 }
  0xf6   :  { %v336_v19 = vadd.f32 %v421_v17, %v386_v16  ;;  %v344_v20 = vadd.f32 %v429_v18, %v386_v16  ;;  %v213_v21 = vpop.f32.mrb[1].mxu0  ;;  %v245_v22 = vpop.f32.mrb[1].mxu1 }
  0xf7   :  { %v334_v23 = vadd.f32 %v386_v16, %v213_v21  ;;  %v342_v24 = vadd.f32 %v386_v16, %v245_v22  ;;  %v422_v25 = vpop.f32.mrb[2].mxu0  ;;  %v430_v26 = vpop.f32.mrb[2].mxu1 }
  0xf8   :  { %352 = vst [vmem:[%s589_s3 + $0x10] sm:$0xff] %v336_v19  ;;  %360 = vst [vmem:[%s589_s3 + $0x50] sm:$0xff] %v344_v20  ;;  %v337_v27 = vadd.f32 %v422_v25, %v386_v16  ;;  %v345_v28 = vadd.f32 %v430_v26, %v386_v16  ;;  %v216_v29 = vpop.f32.mrb[3].mxu0  ;;  %v248_v30 = vpop.f32.mrb[3].mxu1 }
  0xf9   :  { %350 = vst [vmem:[%s589_s3] sm:$0xff] %v334_v23  ;;  %358 = vst [vmem:[%s589_s3 + $0x40] sm:$0xff] %v342_v24  ;;  %v335_v31 = vadd.f32 %v386_v16, %v216_v29  ;;  %v343_v32 = vadd.f32 %v386_v16, %v248_v30 }
  0xfa   :  { %353 = vst [vmem:[%s589_s3 + $0x18] sm:$0xff] %v337_v27  ;;  %361 = vst [vmem:[%s589_s3 + $0x58] sm:$0xff] %v345_v28 }
  0xfb   :  { %351 = vst [vmem:[%s589_s3 + $0x8] sm:$0xff] %v335_v31  ;;  %359 = vst [vmem:[%s589_s3 + $0x48] sm:$0xff] %v343_v32 }
  0xfd   :  { %v425_v33 = vpop.f32.mrb[4].mxu0  ;;  %v433_v34 = vpop.f32.mrb[4].mxu1 }
  0xfe   :  { %v340_v35 = vadd.f32 %v425_v33, %v386_v16  ;;  %v348_v36 = vadd.f32 %v433_v34, %v386_v16  ;;  %v229_v37 = vpop.f32.mrb[5].mxu0  ;;  %v261_v38 = vpop.f32.mrb[5].mxu1 }
  0xff   :  { %v338_v39 = vadd.f32 %v386_v16, %v229_v37  ;;  %v346_v40 = vadd.f32 %v386_v16, %v261_v38  ;;  %v426_v41 = vpop.f32.mrb[6].mxu0  ;;  %v434_v42 = vpop.f32.mrb[6].mxu1 }
 0x100   :  { %356 = vst [vmem:[%s589_s3 + $0x30] sm:$0xff] %v340_v35  ;;  %364 = vst [vmem:[%s589_s3 + $0x70] sm:$0xff] %v348_v36  ;;  %v341_v43 = vadd.f32 %v426_v41, %v386_v16  ;;  %v349_v44 = vadd.f32 %v434_v42, %v386_v16  ;;  %v232_v45 = vpop.f32.mrb[7].mxu0  ;;  %v264_v46 = vpop.f32.mrb[7].mxu1 }
 0x101   :  { %354 = vst [vmem:[%s589_s3 + $0x20] sm:$0xff] %v338_v39  ;;  %362 = vst [vmem:[%s589_s3 + $0x60] sm:$0xff] %v346_v40  ;;  %v339_v47 = vadd.f32 %v386_v16, %v232_v45  ;;  %v347_v48 = vadd.f32 %v386_v16, %v264_v46 }
 0x102   :  { %357 = vst [vmem:[%s589_s3 + $0x38] sm:$0xff] %v341_v43  ;;  %365 = vst [vmem:[%s589_s3 + $0x78] sm:$0xff] %v349_v44 }
 0x103   :  { %355 = vst [vmem:[%s589_s3 + $0x28] sm:$0xff] %v339_v47  ;;  %363 = vst [vmem:[%s589_s3 + $0x68] sm:$0xff] %v347_v48 }

// kernel: encoder_forward.25
= control target key start
LH: loop header
LB: loop body
LE: loop exit
PB: predicated region body
PF: predicated region fallthrough
CT: control target
= control target key end

     0   :  { %s400_s6 = smov 0   ;;  %s402_s7 = smov 0   ;;  %s464_s0 = inlined_call_operand.vmem [shape: f32[2,64,16], index: 0, kind: input, shape index: {}]   ;;  %s465_s1 = inlined_call_operand.vmem [shape: f32[2,64,16], index: 1, kind: output, shape index: {}]  }
   0x1   :  { %s404_s8 = smov 0  }
   0x2 LB: > { %s23_s9 = sadd.s32 1, %s384_s7  ;;  %p331_p0 = scmp.ge.s32.totalorder %s388_s8, 1  ;;  %s388_s8 = sphi %s404_s8, %s11_s8   ;;  %s384_s7 = sphi %s402_s7, %s467_s7   ;;  %s380_s6 = sphi %s400_s6, %s466_s6  }
   0x3   : > { %p25_p1 = scmp.ge.s32.totalorder %s23_s9, 2  ;;  %p106_p2 = scmp.lt.s32.totalorder %s388_s8, 3 }
   0x5   : > { %s469_s9 = smov (%p25_p1, %s23_s9), 0  ;;  %p107_p3 = pnand %p331_p0, %p106_p2 }
   0x6   : > { %p132_p4 = scmp.lt.s32.totalorder (!%p107_p3), %s380_s6, 1  ;;  %vm156_vm0 = vcmask (!%p107_p3), 130048  }
   0x7   : > { %110 = sbr.rel (%p107_p3) target bundleno = 101 (0x65), region = 24 }
   0xe   : > { %s471_s6 = smov (!%p132_p4, %s380_s6), 1 }
   0xf   : > { %s338_s10 = sshll.u32 %s471_s6, 6 }
  0x10   : > { %s139_s13 = scalar_lea.vmem %s464_s0, %s338_s10  ;;  %s147_s16 = scalar_lea.vmem %s465_s1, %s338_s10 }
  0x11   : > { %v148_v0 = vld [vmem:[%s139_s13] sm:$0xff]  ;;  %v149_v1 = vld [vmem:[%s139_s13 + $0x8] sm:$0xff]  ;;  %v150_v2 = vld [vmem:[%s139_s13 + $0x10] sm:$0xff] }
  0x12   : > { %v151_v3 = vld [vmem:[%s139_s13 + $0x18] sm:$0xff]  ;;  %v157_v4 = vsel %vm156_vm0, %v148_v0, 0.0  ;;  %v158_v5 = vsel %vm156_vm0, %v149_v1, 0.0  ;;  %v160_v6 = vsel %vm156_vm0, %v150_v2, 0.0  ;;  %v152_v7 = vld [vmem:[%s139_s13 + $0x20] sm:$0xff]  ;;  %v153_v10 = vld [vmem:[%s139_s13 + $0x28] sm:$0xff] }
  0x13   : > { %v159_v8 = vadd.f32 %v158_v5, %v157_v4  ;;  %v162_v9 = vsel %vm156_vm0, %v151_v3, 0.0  ;;  %v164_v12 = vsel %vm156_vm0, %v152_v7, 0.0  ;;  %v154_v13 = vld [vmem:[%s139_s13 + $0x30] sm:$0xff]  ;;  %v166_v15 = vsel %vm156_vm0, %v153_v10, 0.0  ;;  %v155_v16 = vld [vmem:[%s139_s13 + $0x38] sm:$0xff] }
  0x14   : > { %v168_v18 = vsel %vm156_vm0, %v154_v13, 0.0  ;;  %v170_v20 = vsel %vm156_vm0, %v155_v16, 0.0 }
  0x15   : > { %v161_v11 = vadd.f32 %v160_v6, %v159_v8 }
  0x17   : > { %v163_v14 = vadd.f32 %v162_v9, %v161_v11 }
  0x19   : > { %v165_v17 = vadd.f32 %v164_v12, %v163_v14 }
  0x1b   : > { %v167_v19 = vadd.f32 %v166_v15, %v165_v17 }
  0x1d   : > { %v169_v21 = vadd.f32 %v168_v18, %v167_v19 }
  0x1f   : > { %v171_v22 = vadd.f32 %v170_v20, %v169_v21 }
  0x21   : > { %v172_v23 = vrot.slane %v171_v22, 4 }
  0x23   : > { %v173_v24 = vadd.f32 %v172_v23, %v171_v22 }
  0x25   : > { %v174_v25 = vrot.slane %v173_v24, 2 }
  0x27   : > { %v175_v26 = vadd.f32 %v174_v25, %v173_v24 }
  0x29   : > { %v176_v27 = vrot.slane %v175_v26, 1 }
  0x2b   : > { %v177_v28 = vadd.f32 %v176_v27, %v175_v26 }
  0x2d   : > { %v179_v29 = vmul.f32 0.015625, %v177_v28 }
  0x2f   : > { %v180_v30 = vsub.f32 %v148_v0, %v179_v29  ;;  %v181_v31 = vsub.f32 %v149_v1, %v179_v29  ;;  %v182_v32 = vsub.f32 %v150_v2, %v179_v29  ;;  %v183_v33 = vsub.f32 %v151_v3, %v179_v29 }
  0x30   : > { %v184_v34 = vsub.f32 %v152_v7, %v179_v29  ;;  %v185_v35 = vsub.f32 %v153_v10, %v179_v29  ;;  %v186_v40 = vsub.f32 %v154_v13, %v179_v29  ;;  %v187_v46 = vsub.f32 %v155_v16, %v179_v29 }
  0x31   : > { %v188_v36 = vmul.f32 %v180_v30, %v180_v30  ;;  %v189_v37 = vmul.f32 %v181_v31, %v181_v31  ;;  %v190_v38 = vmul.f32 %v182_v32, %v182_v32  ;;  %v191_v39 = vmul.f32 %v183_v33, %v183_v33 }
  0x32   : > { %v192_v41 = vmul.f32 %v184_v34, %v184_v34  ;;  %v193_v47 = vmul.f32 %v185_v35, %v185_v35  ;;  %v194_v50 = vmul.f32 %v186_v40, %v186_v40  ;;  %v195_v53 = vmul.f32 %v187_v46, %v187_v46 }
  0x33   : > { %v196_v42 = vsel %vm156_vm0, %v188_v36, 0.0  ;;  %v197_v43 = vsel %vm156_vm0, %v189_v37, 0.0  ;;  %v199_v44 = vsel %vm156_vm0, %v190_v38, 0.0  ;;  %v201_v48 = vsel %vm156_vm0, %v191_v39, 0.0 }
  0x34   : > { %v198_v45 = vadd.f32 %v197_v43, %v196_v42  ;;  %v203_v51 = vsel %vm156_vm0, %v192_v41, 0.0  ;;  %v205_v54 = vsel %vm156_vm0, %v193_v47, 0.0  ;;  %v207_v56 = vsel %vm156_vm0, %v194_v50, 0.0 }
  0x35   : > { %v209_v58 = vsel %vm156_vm0, %v195_v53, 0.0 }
  0x36   : > { %v200_v49 = vadd.f32 %v199_v44, %v198_v45 }
  0x38   : > { %v202_v52 = vadd.f32 %v201_v48, %v200_v49 }
  0x3a   : > { %v204_v55 = vadd.f32 %v203_v51, %v202_v52 }
  0x3c   : > { %v206_v57 = vadd.f32 %v205_v54, %v204_v55 }
  0x3e   : > { %v208_v59 = vadd.f32 %v207_v56, %v206_v57 }
  0x40   : > { %v210_v60 = vadd.f32 %v209_v58, %v208_v59 }
  0x42   : > { %v211_v61 = vrot.slane %v210_v60, 4 }
  0x44   : > { %v212_v62 = vadd.f32 %v211_v61, %v210_v60 }
  0x46   : > { %v213_v63 = vrot.slane %v212_v62, 2 }
  0x48   : > { %v214_v0 = vadd.f32 %v213_v63, %v212_v62 }
  0x4a   : > { %v215_v1 = vrot.slane %v214_v0, 1 }
  0x4c   : > { %v216_v2 = vadd.f32 %v215_v1, %v214_v0 }
  0x4e   : > { %v217_v3 = vmul.f32 0.015625, %v216_v2 }
  0x50   : > { %v218_v4 = vadd.f32 1e-05, %v217_v3 }
  0x52   : > { %364 = vrsqrt.f32 %v218_v4 }
  0x5c   : > { %v365_v5 = vpop.eup %364 }
  0x5d   : > { %v220_v6 = vmul.f32 %v365_v5, %v180_v30  ;;  %v221_v7 = vmul.f32 %v365_v5, %v181_v31  ;;  %v222_v8 = vmul.f32 %v365_v5, %v182_v32  ;;  %v223_v9 = vmul.f32 %v365_v5, %v183_v33 }
  0x5e   : > { %v224_v10 = vmul.f32 %v365_v5, %v184_v34  ;;  %v225_v11 = vmul.f32 %v365_v5, %v185_v35  ;;  %v226_v12 = vmul.f32 %v365_v5, %v186_v40  ;;  %v227_v13 = vmul.f32 %v365_v5, %v187_v46 }
  0x5f   : > { %v228_v14 = vmax.f32 %v220_v6, 0.0  ;;  %v229_v15 = vmax.f32 %v221_v7, 0.0  ;;  %v230_v16 = vmax.f32 %v222_v8, 0.0  ;;  %v231_v17 = vmax.f32 %v223_v9, 0.0 }
  0x60   : > { %v232_v18 = vmax.f32 %v224_v10, 0.0  ;;  %v233_v19 = vmax.f32 %v225_v11, 0.0  ;;  %v234_v20 = vmax.f32 %v226_v12, 0.0  ;;  %v235_v21 = vmax.f32 %v227_v13, 0.0 }
  0x61   : > { %236 = vst.msk [vmem:[%s147_s16] sm:$0xff] %vm156_vm0, %v228_v14  ;;  %237 = vst.msk [vmem:[%s147_s16 + $0x8] sm:$0xff] %vm156_vm0, %v229_v15 }
  0x62   : > { %238 = vst.msk [vmem:[%s147_s16 + $0x10] sm:$0xff] %vm156_vm0, %v230_v16  ;;  %239 = vst.msk [vmem:[%s147_s16 + $0x18] sm:$0xff] %vm156_vm0, %v231_v17 }
  0x63   : > { %240 = vst.msk [vmem:[%s147_s16 + $0x20] sm:$0xff] %vm156_vm0, %v232_v18  ;;  %241 = vst.msk [vmem:[%s147_s16 + $0x28] sm:$0xff] %vm156_vm0, %v233_v19 }
  0x64   : > { %242 = vst.msk [vmem:[%s147_s16 + $0x30] sm:$0xff] %vm156_vm0, %v234_v20  ;;  %243 = vst.msk [vmem:[%s147_s16 + $0x38] sm:$0xff] %vm156_vm0, %v235_v21 }
  0x65 PF: > { %s11_s8 = sadd.s32 1, %s388_s8   ;;  %s466_s6 = smov %s384_s7 }
  0x66   : > { %p8_p5 = scmp.ge.s32.totalorder %s11_s8, 4   ;;  %s467_s7 = smov %s469_s9 }
  0x68   :  { %10 = sbr.rel (!%p8_p5) target bundleno = 2 (0x2), region = 54 }

// kernel: encoder_forward.26
= control target key start
LH: loop header
LB: loop body
LE: loop exit
PB: predicated region body
PF: predicated region fallthrough
CT: control target
= control target key end

     0   :  { %s444_s1 = inlined_call_operand.vmem [shape: bf16[256,128], index: 1, kind: input, shape index: {}]   ;;  %s445_s0 = inlined_call_operand.vmem [shape: bf16[32,256], index: 0, kind: input, shape index: {}]   ;;  %s446_s2 = inlined_call_operand.vmem [shape: f32[1,128], index: 2, kind: input, shape index: {}]   ;;  %s447_s3 = inlined_call_operand.vmem [shape: f32[32,128], index: 3, kind: output, shape index: {}]  }
   0x1   :  { %v327_v0 = vld [vmem:[%s444_s1 + $0x40] sm:$0xff]   ;;  %v329_v2 = vld [vmem:[%s444_s1 + $0x48] sm:$0xff]   ;;  %v331_v4 = vld [vmem:[%s444_s1 + $0x50] sm:$0xff]  }
   0x2   :  { %v328_v1 = vld [vmem:[%s444_s1] sm:$0xff]   ;;  %283 = vmatprep.subr.bf16.mxu0 %v327_v0  ;;  %311 = vmatprep.subr.bf16.mxu1 %v327_v0  ;;  %v330_v3 = vld [vmem:[%s444_s1 + $0x8] sm:$0xff]   ;;  %v332_v5 = vld [vmem:[%s444_s1 + $0x10] sm:$0xff]  }
   0x3   :  { %284 = vmatpush3.bf16.msra.mxu0 %v328_v1  ;;  %319 = vmatpush3.bf16.msra.mxu1 %v328_v1  ;;  %v333_v6 = vld [vmem:[%s444_s1 + $0x58] sm:$0xff]   ;;  %v335_v8 = vld [vmem:[%s444_s1 + $0x60] sm:$0xff]   ;;  %v337_v10 = vld [vmem:[%s444_s1 + $0x68] sm:$0xff]  }
   0x4   :  { %285 = vmatprep.subr.bf16.mxu0 %v329_v2  ;;  %312 = vmatprep.subr.bf16.mxu1 %v329_v2  ;;  %v334_v7 = vld [vmem:[%s444_s1 + $0x18] sm:$0xff]   ;;  %v336_v9 = vld [vmem:[%s444_s1 + $0x20] sm:$0xff]   ;;  %v338_v13 = vld [vmem:[%s444_s1 + $0x28] sm:$0xff]  }
   0x5   :  { %v345_v11 = vld [vmem:[%s445_s0 + $0x4] ss:$8 sps:$4 sm:$0xff]   ;;  %v348_v12 = vld [vmem:[%s445_s0 + $0x14] ss:$8 sps:$4 sm:$0xff]   ;;  %v343_v18 = vld [vmem:[%s445_s0] ss:$8 sps:$4 sm:$0xff]  }
   0x6   :  { %v339_v14 = vld [vmem:[%s444_s1 + $0x70] sm:$0xff]   ;;  %211 = vmatprep.mubr.bf16.mxu0 %v345_v11  ;;  %219 = vmatprep.mubr.bf16.mxu1 %v348_v12  ;;  %v341_v16 = vld [vmem:[%s444_s1 + $0x78] sm:$0xff]   ;;  %v282_v23 = vld [vmem:[%s446_s2] ss:$0 sm:$0xff] }
   0x7   :  { %286 = vmatpush3.bf16.msra.mxu0 %v330_v3  ;;  %320 = vmatpush3.bf16.msra.mxu1 %v330_v3  ;;  %v340_v15 = vld [vmem:[%s444_s1 + $0x30] sm:$0xff]   ;;  %v342_v17 = vld [vmem:[%s444_s1 + $0x38] sm:$0xff]  }
   0x8   :  { %287 = vmatprep.subr.bf16.mxu0 %v331_v4  ;;  %313 = vmatprep.subr.bf16.mxu1 %v331_v4  ;;  %v346_v19 = vld [vmem:[%s445_s0 + $0x10] ss:$8 sps:$4 sm:$0xff]  }
   0xb   :  { %288 = vmatpush3.bf16.msra.mxu0 %v332_v5  ;;  %321 = vmatpush3.bf16.msra.mxu1 %v332_v5 }
   0xc   :  { %289 = vmatprep.subr.bf16.mxu0 %v333_v6  ;;  %314 = vmatprep.subr.bf16.mxu1 %v333_v6 }
   0xf   :  { %290 = vmatpush3.bf16.msra.mxu0 %v334_v7  ;;  %322 = vmatpush3.bf16.msra.mxu1 %v334_v7 }
  0x10   :  { %291 = vmatprep.subr.bf16.mxu0 %v335_v8  ;;  %315 = vmatprep.subr.bf16.mxu1 %v335_v8 }
  0x13   :  { %292 = vmatpush3.bf16.msra.mxu0 %v336_v9  ;;  %323 = vmatpush3.bf16.msra.mxu1 %v336_v9 }
  0x14   :  { %293 = vmatprep.subr.bf16.mxu0 %v337_v10  ;;  %316 = vmatprep.subr.bf16.mxu1 %v337_v10 }
  0x17   :  { %294 = vmatpush3.bf16.msra.mxu0 %v338_v13  ;;  %324 = vmatpush3.bf16.msra.mxu1 %v338_v13 }
  0x18   :  { %295 = vmatprep.subr.bf16.mxu0 %v339_v14  ;;  %317 = vmatprep.subr.bf16.mxu1 %v339_v14 }
  0x1b   :  { %296 = vmatpush3.bf16.msra.mxu0 %v340_v15  ;;  %325 = vmatpush3.bf16.msra.mxu1 %v340_v15 }
  0x1c   :  { %297 = vmatprep.subr.bf16.mxu0 %v341_v16  ;;  %318 = vmatprep.subr.bf16.mxu1 %v341_v16 }
  0x1f   :  { %298 = vmatpush3.bf16.msra.mxu0 %v342_v17  ;;  %326 = vmatpush3.bf16.msra.mxu1 %v342_v17 }
  0x22   :  { %212 = vmatmul.mubr.bf16.vlgmr.msra.gmra.mrb[0].mxu0 %v343_v18  ;;  %220 = vmatmul.mubr.bf16.vlgmr.msra.gmra.mrb[0].mxu1 %v346_v19 }
  0xf5   :  { %v299_v20 = vpop.f32.mrb[0].mxu0  ;;  %v305_v21 = vpop.f32.mrb[0].mxu1 }
  0xf6   :  { %v300_v22 = vpop.f32.mrb[1].mxu0  ;;  %v306_v24 = vpop.f32.mrb[1].mxu1 }
  0xf7   :  { %v301_v25 = vadd.f32 %v300_v22, %v299_v20  ;;  %v307_v26 = vadd.f32 %v306_v24, %v305_v21  ;;  %v302_v27 = vpop.f32.mrb[2].mxu0  ;;  %v308_v28 = vpop.f32.mrb[2].mxu1 }
  0xf8   :  { %v303_v29 = vpop.f32.mrb[3].mxu0  ;;  %v309_v30 = vpop.f32.mrb[3].mxu1 }
  0xf9   :  { %v250_v31 = vadd.f32 %v301_v25, %v282_v23  ;;  %v252_v32 = vadd.f32 %v307_v26, %v282_v23  ;;  %v304_v33 = vadd.f32 %v303_v29, %v302_v27  ;;  %v310_v34 = vadd.f32 %v309_v30, %v308_v28 }
  0xfb   :  { %254 = vst [vmem:[%s447_s3] sm:$0xff] %v250_v31  ;;  %256 = vst [vmem:[%s447_s3 + $0x10] sm:$0xff] %v252_v32  ;;  %v251_v35 = vadd.f32 %v304_v33, %v282_v23  ;;  %v253_v36 = vadd.f32 %v310_v34, %v282_v23 }
  0xfd   :  { %255 = vst [vmem:[%s447_s3 + $0x8] sm:$0xff] %v251_v35  ;;  %257 = vst [vmem:[%s447_s3 + $0x18] sm:$0xff] %v253_v36 }

// kernel: encoder_forward.27
= control target key start
LH: loop header
LB: loop body
LE: loop exit
PB: predicated region body
PF: predicated region fallthrough
CT: control target
= control target key end

     0   :  { %s340_s6 = smov 0   ;;  %s342_s7 = smov 0   ;;  %s386_s0 = inlined_call_operand.vmem [shape: f32[2,16,32], index: 0, kind: input, shape index: {}]   ;;  %s387_s1 = inlined_call_operand.vmem [shape: f32[2,16,32], index: 1, kind: output, shape index: {}]  }
   0x1   :  { %s344_s8 = smov 0  }
   0x2 LB: > { %s23_s9 = sadd.s32 1, %s324_s7  ;;  %p271_p0 = scmp.ge.s32.totalorder %s328_s8, 1  ;;  %s328_s8 = sphi %s344_s8, %s11_s8   ;;  %s324_s7 = sphi %s342_s7, %s389_s7   ;;  %s320_s6 = sphi %s340_s6, %s388_s6  }
   0x3   : > { %p25_p1 = scmp.ge.s32.totalorder %s23_s9, 2  ;;  %p106_p2 = scmp.lt.s32.totalorder %s328_s8, 3 }
   0x5   : > { %s391_s9 = smov (%p25_p1, %s23_s9), 0  ;;  %p107_p3 = pnand %p271_p0, %p106_p2 }
   0x6   : > { %p132_p4 = scmp.lt.s32.totalorder (!%p107_p3), %s320_s6, 1  ;;  %vm150_vm0 = vcmask (!%p107_p3), 261120  }
   0x7   : > { %110 = sbr.rel (%p107_p3) target bundleno = 74 (0x4a), region = 24 }
   0xe   : > { %s393_s6 = smov (!%p132_p4, %s320_s6), 1 }
   0xf   : > { %s278_s10 = sshll.u32 %s393_s6, 4 }
  0x10   : > { %s139_s13 = scalar_lea.vmem %s386_s0, %s278_s10  ;;  %s147_s16 = scalar_lea.vmem %s387_s1, %s278_s10 }
  0x11   : > { %v148_v0 = vld [vmem:[%s139_s13] sm:$0xff]  ;;  %v149_v1 = vld [vmem:[%s139_s13 + $0x8] sm:$0xff] }
  0x12   : > { %v151_v2 = vsel %vm150_vm0, %v148_v0, 0.0  ;;  %v152_v3 = vsel %vm150_vm0, %v149_v1, 0.0 }
  0x13   : > { %v153_v4 = vadd.f32 %v152_v3, %v151_v2 }
  0x15   : > { %v154_v5 = vrot.slane %v153_v4, 4 }
  0x17   : > { %v155_v6 = vadd.f32 %v154_v5, %v153_v4 }
  0x19   : > { %v156_v7 = vrot.slane %v155_v6, 2 }
  0x1b   : > { %v157_v8 = vadd.f32 %v156_v7, %v155_v6 }
  0x1d   : > { %v158_v9 = vrot.slane %v157_v8, 1 }
  0x1f   : > { %v159_v10 = vadd.f32 %v158_v9, %v157_v8 }
  0x21   : > { %v161_v11 = vmul.f32 0.0625, %v159_v10 }
  0x23   : > { %v162_v12 = vsub.f32 %v148_v0, %v161_v11  ;;  %v163_v13 = vsub.f32 %v149_v1, %v161_v11 }
  0x25   : > { %v164_v14 = vmul.f32 %v162_v12, %v162_v12  ;;  %v165_v15 = vmul.f32 %v163_v13, %v163_v13 }
  0x27   : > { %v166_v16 = vsel %vm150_vm0, %v164_v14, 0.0  ;;  %v167_v17 = vsel %vm150_vm0, %v165_v15, 0.0 }
  0x28   : > { %v168_v18 = vadd.f32 %v167_v17, %v166_v16 }
  0x2a   : > { %v169_v19 = vrot.slane %v168_v18, 4 }
  0x2c   : > { %v170_v20 = vadd.f32 %v169_v19, %v168_v18 }
  0x2e   : > { %v171_v21 = vrot.slane %v170_v20, 2 }
  0x30   : > { %v172_v22 = vadd.f32 %v171_v21, %v170_v20 }
  0x32   : > { %v173_v23 = vrot.slane %v172_v22, 1 }
  0x34   : > { %v174_v24 = vadd.f32 %v173_v23, %v172_v22 }
  0x36   : > { %v175_v25 = vmul.f32 0.0625, %v174_v24 }
  0x38   : > { %v176_v26 = vadd.f32 1e-05, %v175_v25 }
  0x3a   : > { %304 = vrsqrt.f32 %v176_v26 }
  0x44   : > { %v305_v27 = vpop.eup %304 }
  0x45   : > { %v178_v28 = vmul.f32 %v305_v27, %v162_v12  ;;  %v179_v29 = vmul.f32 %v305_v27, %v163_v13 }
  0x47   : > { %v180_v30 = vmax.f32 %v178_v28, 0.0  ;;  %v181_v31 = vmax.f32 %v179_v29, 0.0 }
  0x49   : > { %182 = vst.msk [vmem:[%s147_s16] sm:$0xff] %vm150_vm0, %v180_v30  ;;  %183 = vst.msk [vmem:[%s147_s16 + $0x8] sm:$0xff] %vm150_vm0, %v181_v31 }
  0x4a PF: > { %s11_s8 = sadd.s32 1, %s328_s8   ;;  %s388_s6 = smov %s324_s7 }
  0x4b   : > { %p8_p5 = scmp.ge.s32.totalorder %s11_s8, 4   ;;  %s389_s7 = smov %s391_s9 }
  0x4d   :  { %10 = sbr.rel (!%p8_p5) target bundleno = 2 (0x2), region = 54 }

// kernel: encoder_forward.31
= control target key start
LH: loop header
LB: loop body
LE: loop exit
PB: predicated region body
PF: predicated region fallthrough
CT: control target
= control target key end

     0   :  { %s426_s9 = smov 0   ;;  %s428_s10 = smov 0   ;;  %s473_s0 = inlined_call_operand.vmem [shape: f32[2,16,32], index: 0, kind: input, shape index: {}]   ;;  %s474_s1 = inlined_call_operand.vmem [shape: f32[2,16,32], index: 1, kind: input, shape index: {}]   ;;  %s475_s2 = inlined_call_operand.vmem [shape: f32[2,16,32], index: 2, kind: output, shape index: {}]  }
   0x1   :  { %s430_s11 = smov 0  }
   0x2 LB: > { %s24_s12 = sadd.s32 1, %s405_s10  ;;  %p349_p0 = scmp.ge.s32.totalorder %s409_s11, 1  ;;  %s409_s11 = sphi %s430_s11, %s12_s11   ;;  %s405_s10 = sphi %s428_s10, %s477_s10   ;;  %s401_s9 = sphi %s426_s9, %s476_s9  }
   0x3   : > { %p26_p1 = scmp.ge.s32.totalorder %s24_s12, 2  ;;  %p146_p2 = scmp.lt.s32.totalorder %s409_s11, 3 }
   0x5   : > { %s479_s12 = smov (%p26_p1, %s24_s12), 0  ;;  %p147_p3 = pnand %p349_p0, %p146_p2 }
   0x6   : > { %p182_p4 = scmp.lt.s32.totalorder (!%p147_p3), %s401_s9, 1  ;;  %vm208_vm0 = vcmask (!%p147_p3), 261120  }
   0x7   : > { %150 = sbr.rel (%p147_p3) target bundleno = 74 (0x4a), region = 28 }
   0xe   : > { %s481_s9 = smov (!%p182_p4, %s401_s9), 1 }
   0xf   : > { %s444_s13 = sshll.u32 %s481_s9, 4 }
  0x10   : > { %s189_s16 = scalar_lea.vmem %s473_s0, %s444_s13  ;;  %s197_s19 = scalar_lea.vmem %s474_s1, %s444_s13 }
  0x11   : > { %v206_v0 = vld [vmem:[%s189_s16] sm:$0xff]  ;;  %v207_v1 = vld [vmem:[%s189_s16 + $0x8] sm:$0xff]  ;;  %s205_s22 = scalar_lea.vmem %s475_s2, %s444_s13 }
  0x12   : > { %v209_v2 = vsel %vm208_vm0, %v206_v0, 0.0  ;;  %v210_v3 = vsel %vm208_vm0, %v207_v1, 0.0  ;;  %v238_v28 = vld [vmem:[%s197_s19] sm:$0xff]  ;;  %v239_v29 = vld [vmem:[%s197_s19 + $0x8] sm:$0xff] }
  0x13   : > { %v211_v4 = vadd.f32 %v210_v3, %v209_v2 }
  0x15   : > { %v212_v5 = vrot.slane %v211_v4, 4 }
  0x17   : > { %v213_v6 = vadd.f32 %v212_v5, %v211_v4 }
  0x19   : > { %v214_v7 = vrot.slane %v213_v6, 2 }
  0x1b   : > { %v215_v8 = vadd.f32 %v214_v7, %v213_v6 }
  0x1d   : > { %v216_v9 = vrot.slane %v215_v8, 1 }
  0x1f   : > { %v217_v10 = vadd.f32 %v216_v9, %v215_v8 }
  0x21   : > { %v219_v11 = vmul.f32 0.0625, %v217_v10 }
  0x23   : > { %v220_v12 = vsub.f32 %v206_v0, %v219_v11  ;;  %v221_v13 = vsub.f32 %v207_v1, %v219_v11 }
  0x25   : > { %v222_v14 = vmul.f32 %v220_v12, %v220_v12  ;;  %v223_v15 = vmul.f32 %v221_v13, %v221_v13 }
  0x27   : > { %v224_v16 = vsel %vm208_vm0, %v222_v14, 0.0  ;;  %v225_v17 = vsel %vm208_vm0, %v223_v15, 0.0 }
  0x28   : > { %v226_v18 = vadd.f32 %v225_v17, %v224_v16 }
  0x2a   : > { %v227_v19 = vrot.slane %v226_v18, 4 }
  0x2c   : > { %v228_v20 = vadd.f32 %v227_v19, %v226_v18 }
  0x2e   : > { %v229_v21 = vrot.slane %v228_v20, 2 }
  0x30   : > { %v230_v22 = vadd.f32 %v229_v21, %v228_v20 }
  0x32   : > { %v231_v23 = vrot.slane %v230_v22, 1 }
  0x34   : > { %v232_v24 = vadd.f32 %v231_v23, %v230_v22 }
  0x36   : > { %v233_v25 = vmul.f32 0.0625, %v232_v24 }
  0x38   : > { %v234_v26 = vadd.f32 1e-05, %v233_v25 }
  0x3a   : > { %385 = vrsqrt.f32 %v234_v26 }
  0x44   : > { %v386_v27 = vpop.eup %385 }
  0x45   : > { %v236_v30 = vmul.f32 %v386_v27, %v220_v12  ;;  %v237_v31 = vmul.f32 %v386_v27, %v221_v13 }
  0x47   : > { %v240_v32 = vadd.f32 %v238_v28, %v236_v30  ;;  %v241_v33 = vadd.f32 %v239_v29, %v237_v31 }
  0x49   : > { %242 = vst.msk [vmem:[%s205_s22] sm:$0xff] %vm208_vm0, %v240_v32  ;;  %243 = vst.msk [vmem:[%s205_s22 + $0x8] sm:$0xff] %vm208_vm0, %v241_v33 }
  0x4a PF: > { %s12_s11 = sadd.s32 1, %s409_s11   ;;  %s476_s9 = smov %s405_s10 }
  0x4b   : > { %p9_p5 = scmp.ge.s32.totalorder %s12_s11, 4   ;;  %s477_s10 = smov %s479_s12 }
  0x4d   :  { %11 = sbr.rel (!%p9_p5) target bundleno = 2 (0x2), region = 61 }

// kernel: encoder_forward.28
= control target key start
LH: loop header
LB: loop body
LE: loop exit
PB: predicated region body
PF: predicated region fallthrough
CT: control target
= control target key end

     0   :  { %s637_s1 = inlined_call_operand.vmem [shape: bf16[384,128], index: 1, kind: input, shape index: {}]   ;;  %s638_s0 = inlined_call_operand.vmem [shape: bf16[32,384], index: 0, kind: input, shape index: {}]   ;;  %s639_s2 = inlined_call_operand.vmem [shape: f32[1,128], index: 2, kind: input, shape index: {}]   ;;  %s640_s3 = inlined_call_operand.vmem [shape: f32[32,128], index: 3, kind: output, shape index: {}]  }
   0x1   :  { %v480_v0 = vld [vmem:[%s637_s1 + $0x40] sm:$0xff]   ;;  %v483_v3 = vld [vmem:[%s637_s1 + $0x48] sm:$0xff]   ;;  %v486_v6 = vld [vmem:[%s637_s1 + $0x50] sm:$0xff]  }
   0x2   :  { %v481_v1 = vld [vmem:[%s637_s1] sm:$0xff]   ;;  %422 = vmatprep.subr.bf16.mxu0 %v480_v0  ;;  %v484_v4 = vld [vmem:[%s637_s1 + $0x8] sm:$0xff]   ;;  %v487_v7 = vld [vmem:[%s637_s1 + $0x10] sm:$0xff]  }
   0x3   :  { %v482_v2 = vld [vmem:[%s637_s1 + $0x80] sm:$0xff]   ;;  %423 = vmatpush3.bf16.msra.mxu0 %v481_v1  ;;  %v485_v5 = vld [vmem:[%s637_s1 + $0x88] sm:$0xff]   ;;  %v488_v8 = vld [vmem:[%s637_s1 + $0x90] sm:$0xff]  }
   0x4   :  { %460 = vmatprep.subr.bf16.mxu1 %v482_v2  ;;  %424 = vmatprep.subr.bf16.mxu0 %v483_v3  ;;  %v489_v9 = vld [vmem:[%s637_s1 + $0x58] sm:$0xff]   ;;  %v492_v12 = vld [vmem:[%s637_s1 + $0x60] sm:$0xff]   ;;  %v495_v15 = vld [vmem:[%s637_s1 + $0x68] sm:$0xff]  }
   0x5   :  { %461 = vmatpush3.bf16.msra.mxu1 %v482_v2  ;;  %v490_v10 = vld [vmem:[%s637_s1 + $0x18] sm:$0xff]   ;;  %v494_v13 = vld [vmem:[%s637_s1 + $0xa0] sm:$0xff]   ;;  %v497_v16 = vld [vmem:[%s637_s1 + $0xa8] sm:$0xff]  }
   0x6   :  { %462 = vmatprep.subr.bf16.mxu1 %v485_v5  ;;  %v491_v11 = vld [vmem:[%s637_s1 + $0x98] sm:$0xff]   ;;  %v493_v14 = vld [vmem:[%s637_s1 + $0x20] sm:$0xff]   ;;  %v496_v17 = vld [vmem:[%s637_s1 + $0x28] sm:$0xff]  }
   0x7   :  { %425 = vmatpush3.bf16.msra.mxu0 %v484_v4  ;;  %v498_v18 = vld [vmem:[%s637_s1 + $0x70] sm:$0xff]   ;;  %v501_v21 = vld [vmem:[%s637_s1 + $0x78] sm:$0xff]   ;;  %v504_v26 = vld [vmem:[%s638_s0] ss:$12 sps:$4 sm:$0xff]  }
   0x8   :  { %426 = vmatprep.subr.bf16.mxu0 %v486_v6  ;;  %v499_v19 = vld [vmem:[%s637_s1 + $0x30] sm:$0xff]   ;;  %v503_v22 = vld [vmem:[%s637_s1 + $0xb8] sm:$0xff]   ;;  %v508_v28 = vld [vmem:[%s638_s0 + $0x20] ss:$12 sps:$4 sm:$0xff]  }
   0x9   :  { %463 = vmatpush3.bf16.msra.mxu1 %v485_v5  ;;  %v500_v20 = vld [vmem:[%s637_s1 + $0xb0] sm:$0xff]   ;;  %v502_v25 = vld [vmem:[%s637_s1 + $0x38] sm:$0xff]   ;;  %v421_v37 = vld [vmem:[%s639_s2] ss:$0 sm:$0xff] }
   0xa   :  { %464 = vmatprep.subr.bf16.mxu1 %v488_v8  ;;  %v506_v23 = vld [vmem:[%s638_s0 + $0x4] ss:$12 sps:$4 sm:$0xff]   ;;  %v507_v24 = vld [vmem:[%s638_s0 + $0x8] ss:$12 sps:$4 sm:$0xff]  }
   0xb   :  { %427 = vmatpush3.bf16.msra.mxu0 %v487_v7  ;;  %291 = vmatprep.mubr.bf16.mxu0 %v506_v23  ;;  %v509_v27 = vld [vmem:[%s638_s0 + $0x1c] ss:$12 sps:$4 sm:$0xff]   ;;  %v511_v29 = vld [vmem:[%s638_s0 + $0x18] ss:$12 sps:$4 sm:$0xff]  }
   0xc   :  { %428 = vmatprep.subr.bf16.mxu0 %v489_v9  ;;  %476 = vmatprep.mubr.bf16.mxu1 %v507_v24 }
   0xd   :  { %465 = vmatpush3.bf16.msra.mxu1 %v488_v8 }
   0xe   :  { %466 = vmatprep.subr.bf16.mxu1 %v491_v11 }
   0xf   :  { %429 = vmatpush3.bf16.msra.mxu0 %v490_v10 }
  0x10   :  { %430 = vmatprep.subr.bf16.mxu0 %v492_v12 }
  0x11   :  { %467 = vmatpush3.bf16.msra.mxu1 %v491_v11 }
  0x12   :  { %468 = vmatprep.subr.bf16.mxu1 %v494_v13 }
  0x13   :  { %431 = vmatpush3.bf16.msra.mxu0 %v493_v14 }
  0x14   :  { %432 = vmatprep.subr.bf16.mxu0 %v495_v15 }
  0x15   :  { %469 = vmatpush3.bf16.msra.mxu1 %v494_v13 }
  0x16   :  { %470 = vmatprep.subr.bf16.mxu1 %v497_v16 }
  0x17   :  { %433 = vmatpush3.bf16.msra.mxu0 %v496_v17 }
  0x18   :  { %434 = vmatprep.subr.bf16.mxu0 %v498_v18 }
  0x19   :  { %471 = vmatpush3.bf16.msra.mxu1 %v497_v16 }
  0x1a   :  { %472 = vmatprep.subr.bf16.mxu1 %v500_v20 }
  0x1b   :  { %435 = vmatpush3.bf16.msra.mxu0 %v499_v19 }
  0x1c   :  { %436 = vmatprep.subr.bf16.mxu0 %v501_v21 }
  0x1d   :  { %473 = vmatpush3.bf16.msra.mxu1 %v500_v20 }
  0x1e   :  { %474 = vmatprep.subr.bf16.mxu1 %v503_v22 }
  0x1f   :  { %437 = vmatpush3.bf16.msra.mxu0 %v502_v25 }
  0x21   :  { %475 = vmatpush3.bf16.msra.mxu1 %v503_v22 }
  0x22   :  { %292 = vmatmul.mubr.bf16.vlgmr.msra.gmra.mrb[0].mxu0 %v504_v26 }
  0x23   :  { %299 = vmatprep.mubr.bf16.mxu0 %v509_v27 }
  0x24   :  { %477 = vmatmul.mubr.bf16.vlgmr.msra.gmra.mrb[0].mxu1 %v508_v28 }
  0x2a   :  { %300 = vmatmul.mubr.bf16.gmra.mrb[4].mxu0 %v511_v29 }
  0xf5   :  { %v438_v30 = vpop.f32.mrb[0].mxu0 }
  0xf6   :  { %v439_v31 = vpop.f32.mrb[1].mxu0 }
  0xf7   :  { %v440_v32 = vadd.f32 %v439_v31, %v438_v30  ;;  %v441_v33 = vpop.f32.mrb[2].mxu0  ;;  %v478_v34 = vpop.f32.mrb[0].mxu1 }
  0xf8   :  { %v442_v35 = vpop.f32.mrb[3].mxu0  ;;  %v342_v36 = vpop.f32.mrb[1].mxu1 }
  0xf9   :  { %v443_v38 = vadd.f32 %v442_v35, %v441_v33  ;;  %v343_v39 = vadd.f32 %v440_v32, %v342_v36  ;;  %v479_v40 = vpop.f32.mrb[2].mxu1 }
  0xfa   :  { %v345_v41 = vpop.f32.mrb[3].mxu1 }
  0xfb   :  { %v379_v42 = vadd.f32 %v421_v37, %v343_v39  ;;  %v346_v43 = vadd.f32 %v443_v38, %v345_v41 }
  0xfd   :  { %383 = vst [vmem:[%s640_s3] sm:$0xff] %v379_v42  ;;  %v380_v44 = vadd.f32 %v421_v37, %v346_v43  ;;  %v444_v45 = vpop.f32.mrb[4].mxu0 }
  0xfe   :  { %v445_v46 = vpop.f32.mrb[5].mxu0 }
  0xff   :  { %384 = vst [vmem:[%s640_s3 + $0x8] sm:$0xff] %v380_v44  ;;  %v446_v47 = vadd.f32 %v445_v46, %v444_v45  ;;  %v447_v48 = vpop.f32.mrb[6].mxu0 }
 0x100   :  { %v448_v49 = vpop.f32.mrb[7].mxu0 }
 0x101   :  { %v351_v50 = vadd.f32 %v478_v34, %v446_v47  ;;  %v449_v51 = vadd.f32 %v448_v49, %v447_v48 }
 0x103   :  { %v381_v52 = vadd.f32 %v421_v37, %v351_v50  ;;  %v354_v53 = vadd.f32 %v479_v40, %v449_v51 }
 0x105   :  { %385 = vst [vmem:[%s640_s3 + $0x10] sm:$0xff] %v381_v52  ;;  %v382_v54 = vadd.f32 %v421_v37, %v354_v53 }
 0x107   :  { %386 = vst [vmem:[%s640_s3 + $0x18] sm:$0xff] %v382_v54 }

// kernel: encoder_forward.43
= control target key start
LH: loop header
LB: loop body
LE: loop exit
PB: predicated region body
PF: predicated region fallthrough
CT: control target
= control target key end

     0   :  { %10 = vsyncpa [#allocation3], 0  ;;  %s935_s0 = inlined_call_operand.vmem [shape: f32[2,16,32], index: 0, kind: input, shape index: {}]   ;;  %s936_s1 = inlined_call_operand.vmem [shape: f32[2,16,32], index: 1, kind: input, shape index: {}]   ;;  %s937_s2 = inlined_call_operand.vmem [shape: f32[2,16,32], index: 2, kind: input, shape index: {}]   ;;  %s938_s3 = inlined_call_operand.hbm [shape: f32[2,16,32], index: 3, kind: output, shape index: {0}]   ;;  %s939_s4 = inlined_call_operand.hbm [shape: f32[2,16,32], index: 4, kind: output, shape index: {1}]  }
   0x1   :  { %12 = vsyncpa [#allocation3 + $0x1], 0 }
   0x2   :  { %13 = vsyncpa [#allocation5], 0 }
   0x3   :  { %15 = vsyncpa [#allocation5 + $0x1], 0  ;;  %s756_s15 = smov 0   ;;  %s758_s16 = smov 0  }
   0x4   :  { %s760_s17 = smov 0   ;;  %s762_s18 = smov 0  }
   0x5   :  { %s764_s19 = smov 0   ;;  %s766_s20 = smov 0  }
   0x6 LB: > { %s525_s21 = sadd.s32 4294967295, %s725_s20   ;;  %s526_s22 = sadd.s32 4294967294, %s725_s20   ;;  %s725_s20 = sphi %s766_s20, %s21_s20   ;;  %s721_s19 = sphi %s764_s19, %s946_s19   ;;  %s717_s18 = sphi %s762_s18, %s945_s18   ;;  %s713_s17 = sphi %s760_s17, %s944_s17   ;;  %s709_s16 = sphi %s758_s16, %s943_s16   ;;  %s705_s15 = sphi %s756_s15, %s942_s15  }
   0x7   : > { %s33_s23 = sadd.s32 1, %s721_s19  ;;  %s126_s24 = sadd.s32 1, %s713_s17 }
   0x8   : > { %p35_p0 = scmp.ge.s32.totalorder %s33_s23, 2  ;;  %p136_p1 = scmp.ne.s32.totalorder %s713_s17, %s709_s16 }
   0x9   : > { %p137_p2 = scmp.eq.s32.totalorder %s525_s21, 1  ;;  %p142_p3 = scmp.ne.s32.totalorder %s709_s16, %s705_s15 }
   0xa   : > { %s948_s23 = smov (%p35_p0, %s33_s23), 0  ;;  %p143_p5 = scmp.eq.s32.totalorder %s526_s22, 1 }
   0xb   : > { %p796_p4 = por %p137_p2, %p136_p1  ;;  %s121_s26 = ssub.s32 %s721_s19, %s948_s23 }
   0xc   : > { %p529_p6 = scmp.ge.s32.totalorder %s725_s20, 1  ;;  %p124_p7 = scmp.eq.s32.totalorder %s121_s26, 0 }
   0xd   : > { %p803_p8 = por %p143_p5, %p142_p3  ;;  %p222_p9 = scmp.lt.s32.totalorder %s725_s20, 3 }
   0xe   : > { %s809_s28 = scalar_select %p124_p7, %s713_s17, %s126_s24  }
   0xf   : > { %p223_p10 = pnand %p529_p6, %p222_p9 }
  0x10   : > { %p272_p11 = scmp.lt.s32.totalorder (!%p223_p10), %s717_s18, 1  ;;  %vm298_vm0 = vcmask (!%p223_p10), 261120   ;;  %s824_s8 = sand.u32 (!%p223_p10), 1, %s709_s16  }
  0x11   : > { %226 = sbr.rel (%p223_p10) target bundleno = 122 (0x7a), region = 32  ;;  %s530_s9 = sshll.u32 (!%p223_p10), %s824_s8, 4 }
  0x12   : > { %s264_s13 = scalar_lea.vmem (!%p223_p10), [#allocation2], %s530_s9  ;;  %s549_s26 = sshll.u32 (!%p223_p10), %s717_s18, 8 }
  0x13   : > { %s360_s14 = sshll.u32 (!%p223_p10), %s264_s13, 4  ;;  %s853_s10 = scalar_lea.hbm (!%p223_p10), %s939_s4, %s549_s26  ;;  %s836_s14 = int_to_ptr.vmem [resolvable:$true] %s360_s14 }
  0x14   : > { %s341_s11 = scalar_lea.sflag (!%p223_p10), [#allocation3], %s824_s8  ;;  %s727_s21 = smov (!%p223_p10), [#allocation2]  }
  0x15   : > { %s619_s22 = sshll.u32 (!%p223_p10), %s727_s21, 4  ;;  %s620_s22 = int_to_ptr.vmem [resolvable:$false] %s619_s22 }
  0x16   : > { %p622_p1 = scmp.lt.s32.totalorder (!%p223_p10), %s836_s14, %s620_s22 }
  0x18   : > { %s273_s29 = scalar_select %p272_p11, %s717_s18, 1 }
  0x19   : > { %s844_s18 = scalar_lea.hbm %s938_s3, %s549_s26 }
  0x1a   : > { %s813_s30 = sshll.u32 %s273_s29, 4  ;;  %s838_s29 = scalar_lea.vmem [#allocation4], %s530_s9 }
  0x1b   : > { %s279_s7 = scalar_lea.vmem %s935_s0, %s813_s30  ;;  %s287_s12 = scalar_lea.vmem %s936_s1, %s813_s30 }
  0x1c   : > { %v296_v0 = vld [vmem:[%s279_s7] sm:$0xff]  ;;  %v297_v1 = vld [vmem:[%s279_s7 + $0x8] sm:$0xff]  ;;  %s295_s24 = scalar_lea.vmem %s937_s2, %s813_s30  ;;  %s377_s5 = sshll.u32 %s838_s29, 4  ;;  %s848_s5 = int_to_ptr.vmem [resolvable:$true] %s377_s5 }
  0x1d   : > { %v299_v2 = vsel %vm298_vm0, %v296_v0, 0.0  ;;  %v300_v3 = vsel %vm298_vm0, %v297_v1, 0.0  ;;  %v328_v28 = vld [vmem:[%s287_s12] sm:$0xff]  ;;  %v329_v29 = vld [vmem:[%s287_s12 + $0x8] sm:$0xff]  ;;  %s615_s12 = scalar_lea.vmem %s836_s14, 256 }
  0x1e   : > { %v301_v4 = vadd.f32 %v300_v3, %v299_v2  ;;  %v334_v32 = vld [vmem:[%s295_s24] sm:$0xff]  ;;  %v335_v33 = vld [vmem:[%s295_s24 + $0x8] sm:$0xff]  ;;  %p616_p12 = scmp.ne.s32.totalorder %s836_s14, %s615_s12  ;;  %s621_s24 = scalar_lea.vmem %s620_s22, 512 }
  0x1f   : > { %p623_p2 = scmp.lt.s32.totalorder %s621_s24, %s615_s12 }
  0x20   : > { %v302_v5 = vrot.slane %v301_v4, 4  ;;  %p617_p13 = pnand %p616_p12, %p796_p4 }
  0x21   : > { %p624_p3 = por %p623_p2, %p622_p1 }
  0x22   : > { %v303_v6 = vadd.f32 %v302_v5, %v301_v4  ;;  %p618_p0 = pneg %p617_p13 }
  0x24   : > { %v304_v7 = vrot.slane %v303_v6, 2  ;;  %p625_p5 = pnand %p624_p3, %p618_p0 }
  0x26   : > { %v305_v8 = vadd.f32 %v304_v7, %v303_v6 }
  0x28   : > { %v306_v9 = vrot.slane %v305_v8, 1 }
  0x2a   : > { %v307_v10 = vadd.f32 %v306_v9, %v305_v8 }
  0x2c   : > { %v309_v11 = vmul.f32 0.0625, %v307_v10 }
  0x2e   : > { %v310_v12 = vsub.f32 %v296_v0, %v309_v11  ;;  %v311_v13 = vsub.f32 %v297_v1, %v309_v11 }
  0x30   : > { %v312_v14 = vmul.f32 %v310_v12, %v310_v12  ;;  %v313_v15 = vmul.f32 %v311_v13, %v311_v13 }
  0x32   : > { %v314_v16 = vsel %vm298_vm0, %v312_v14, 0.0  ;;  %v315_v17 = vsel %vm298_vm0, %v313_v15, 0.0 }
  0x33   : > { %v316_v18 = vadd.f32 %v315_v17, %v314_v16 }
  0x35   : > { %v317_v19 = vrot.slane %v316_v18, 4 }
  0x37   : > { %v318_v20 = vadd.f32 %v317_v19, %v316_v18 }
  0x39   : > { %v319_v21 = vrot.slane %v318_v20, 2 }
  0x3b   : > { %v320_v22 = vadd.f32 %v319_v21, %v318_v20 }
  0x3d   : > { %v321_v23 = vrot.slane %v320_v22, 1 }
  0x3f   : > { %v322_v24 = vadd.f32 %v321_v23, %v320_v22 }
  0x41   : > { %v323_v25 = vmul.f32 0.0625, %v322_v24 }
  0x43   : > { %v324_v26 = vadd.f32 1e-05, %v323_v25 }
  0x45   : > { %613 = vrsqrt.f32 %v324_v26 }
  0x4f   : > { %v614_v27 = vpop.eup %613 }
  0x50   : > { %v326_v30 = vmul.f32 %v614_v27, %v310_v12  ;;  %v327_v31 = vmul.f32 %v614_v27, %v311_v13 }
  0x52   : > { %v330_v34 = vadd.f32 %v328_v28, %v326_v30  ;;  %v331_v35 = vadd.f32 %v329_v29, %v327_v31 }
  0x54   : > { %332 = vst.msk [vmem:[%s264_s13] sm:$0xff] %vm298_vm0, %v330_v34  ;;  %333 = vst.msk [vmem:[%s264_s13 + $0x8] sm:$0xff] %vm298_vm0, %v331_v35  ;;  %v336_v36 = vadd.f32 %v334_v32, %v330_v34  ;;  %v337_v37 = vadd.f32 %v335_v33, %v331_v35 }
  0x55   : > { %628 = shalt.err (!%p625_p5)
}
  0x56   : > { %s629_s13 = scalar_lea.hbm %s844_s18, 256  ;;  %s633_s30 = scalar_lea.hbm %s938_s3, 512 }
  0x57   : > { %p630_p6 = scmp.ne.s32.totalorder %s844_s18, %s629_s13  ;;  %p634_p10 = scmp.lt.u32.totalorder %s844_s18, %s938_s3 }
  0x58   : > { %p635_p11 = scmp.lt.u32.totalorder %s633_s30, %s629_s13  ;;  %p637_p13 = scmp.lt.u32.totalorder %s629_s13, %s844_s18 }
  0x59   : > { %p631_p7 = pnand %p630_p6, %p796_p4 }
  0x5a   : > { %p636_p12 = por %p635_p11, %p634_p10 }
  0x5b   : > { %p632_p9 = pneg %p631_p7 }
  0x5c   : > { %p638_p0 = por %p637_p13, %p636_p12 }
  0x5e   : > { %p639_p1 = pnand %p638_p0, %p632_p9 }
  0x60   : > { %642 = shalt.err (!%p639_p1)
}
  0x61   : > { %s728_s12 = smov 128   ;;  %s729_s21 = smov 8   ;;  %338 = vst.msk [vmem:[%s838_s29] sm:$0xff] %vm298_vm0, %v336_v36  ;;  %339 = vst.msk [vmem:[%s838_s29 + $0x8] sm:$0xff] %vm298_vm0, %v337_v37 }
  0x62   : > { %551 = dma.vmem_to_hbm [thread:$0]  (%p796_p4), %s836_s14, 256, %s844_s18, %s341_s11, %s728_s12, %s728_s12, %s729_s21  }
  0x63   : > { %s346_s22 = scalar_lea.sflag [#allocation5], %s824_s8  ;;  %s643_s24 = scalar_lea.vmem %s848_s5, 256 }
  0x64   : > { %p644_p2 = scmp.ne.s32.totalorder %s848_s5, %s643_s24  ;;  %s730_s13 = smov [#allocation4]  }
  0x65   : > { %s647_s26 = sshll.u32 %s730_s13, 4  ;;  %s648_s26 = int_to_ptr.vmem [resolvable:$false] %s647_s26 }
  0x66   : > { %p645_p3 = pnand %p644_p2, %p796_p4  ;;  %s649_s6 = scalar_lea.vmem %s648_s26, 512 }
  0x67   : > { %p650_p6 = scmp.lt.s32.totalorder %s848_s5, %s648_s26  ;;  %p651_p7 = scmp.lt.s32.totalorder %s649_s6, %s643_s24 }
  0x68   : > { %p646_p5 = pneg %p645_p3 }
  0x69   : > { %p652_p9 = por %p651_p7, %p650_p6 }
  0x6b   : > { %p653_p10 = pnand %p652_p9, %p646_p5 }
  0x6d   : > { %656 = shalt.err (!%p653_p10)
}
  0x6e   : > { %s657_s14 = scalar_lea.hbm %s853_s10, 256  ;;  %s661_s11 = scalar_lea.hbm %s939_s4, 512 }
  0x6f   : > { %p658_p11 = scmp.ne.s32.totalorder %s853_s10, %s657_s14  ;;  %p662_p0 = scmp.lt.u32.totalorder %s853_s10, %s939_s4 }
  0x70   : > { %p663_p1 = scmp.lt.u32.totalorder %s661_s11, %s657_s14  ;;  %p665_p3 = scmp.lt.u32.totalorder %s657_s14, %s853_s10 }
  0x71   : > { %p659_p12 = pnand %p658_p11, %p796_p4 }
  0x72   : > { %p664_p2 = por %p663_p1, %p662_p0 }
  0x73   : > { %p660_p13 = pneg %p659_p12 }
  0x74   : > { %p666_p5 = por %p665_p3, %p664_p2 }
  0x76   : > { %p667_p6 = pnand %p666_p5, %p660_p13 }
  0x78   : > { %670 = shalt.err (!%p667_p6)
}
  0x79   : > { %552 = dma.vmem_to_hbm [thread:$0]  (%p796_p4), %s848_s5, 256, %s853_s10, %s346_s22, %s728_s12, %s728_s12, %s729_s21  }
  0x7a PF: > { %p562_p7 = scmp.ge.s32.totalorder %s725_s20, 2  ;;  %s392_s9 = sand.u32 1, %s705_s15  }
  0x7b   : > { %s393_s24 = scalar_lea.sflag [#allocation3], %s392_s9 }
  0x7c   : > { %p556_p9 = pnand %p562_p7, %p803_p8 }
  0x7e   : > { %696 = dma.done.wait (!%p556_p9), %s393_s24, 256  }
  0x7f   : > { %698 = vsyncadd (!%p556_p9), %s393_s24, 4294967040  ;;  %s402_s25 = scalar_lea.sflag [#allocation5], %s392_s9 }
  0x80   : > { %700 = dma.done.wait (!%p556_p9), %s402_s25, 256  }
  0x81   : > { %702 = vsyncadd (!%p556_p9), %s402_s25, 4294967040  ;;  %s21_s20 = sadd.s32 1, %s725_s20   ;;  %s942_s15 = smov %s709_s16 }
  0x82   : > { %p18_p10 = scmp.ge.s32.totalorder %s21_s20, 4   ;;  %s943_s16 = smov %s713_s17 }
  0x83   : > { %s944_s17 = smov %s809_s28  ;;  %s945_s18 = smov %s721_s19 }
  0x84   : > { %s946_s19 = smov %s948_s23  ;;  %20 = sbr.rel (!%p18_p10) target bundleno = 6 (0x6), region = 90 }
  0x8b   :  { %407 = vsyncpa [#allocation3], 1 }
  0x8c   :  { %409 = vsyncpa [#allocation3 + $0x1], 1 }
  0x8d   :  { %410 = vsyncpa [#allocation5], 1 }
  0x8e   :  { %412 = vsyncpa [#allocation5 + $0x1], 1 }

</bundles_post_ra>
